<compile_context>
chip_gen: v7x
topology: tpu7x:2x2x1
jax: 0.10.0
libtpu: 0.0.40
codegen_flags: <defaults>
</compile_context>

<pallas_src>
import functools

import jax
import jax.numpy as jnp
from jax.experimental import pallas as pl
from jax.experimental.pallas import tpu as pltpu

_VMEM_LIMIT = 32 * 1024 * 1024   # explicit scoped-VMEM cap; raise toward 64-96 MiB on v6e


# ----------------------------- fused forward kernel --------------------------------

def _multimodel_kernel(xq_ref, w0_ref, b0_ref, w1_ref, b1_ref,
                       wd0_ref, bd0_ref, wd1_ref, bd1_ref,
                       wc_ref, bc_ref, wl_ref, bl_ref,
                       det0_ref, det1_ref, cls_ref,
                       f0_ref,
                       *, cin, c0, nc_1, gsz, inv_hw):
    """One grid step == one image: conv0 -> (detect0, f0) -> conv1 -> (detect1, classify)."""
    G = gsz                                   # conv1 output side == conv0 output side // 2

    # ----------------------------- conv0: 3x3 / s2 + SiLU --------------------------------
    # Input is quad-parity grouped: xq[u, P, v, Q*cin + c] = x_pad[4u+P, 4v+Q, c].
    # For each output-parity group (a, b) every tap is a unit-offset static slice, so the
    # whole conv is ONE (4*G*G, 9*cin) x (9*cin, c0) MXU dot (no per-tap dots, no strided
    # or misaligned ref traffic, no per-tap weight slicing).
    xq = xq_ref[0]                                            # (G+1, 4, G+1, 4*cin) f32
    groups = []
    for a in range(2):
        for b in range(2):
            taps = []
            for di in range(3):
                for dj in range(3):
                    R, S = 2 * a + di, 2 * b + dj
                    taps.append(xq[R // 4:R // 4 + G, R % 4,
                                   S // 4:S // 4 + G,
                                   (S % 4) * cin:(S % 4 + 1) * cin])    # (G, G, cin)
            groups.append(jnp.concatenate(taps, axis=-1).reshape(G * G, 9 * cin))
    im2col0 = jnp.concatenate(groups, axis=0)                 # (4*G*G, 9*cin), rows (a,b,ip,jp)
    h0 = jnp.dot(im2col0.astype(jnp.bfloat16), w0_ref[...],
                 preferred_element_type=jnp.float32) + b0_ref[...]
    h0 = h0 * jax.nn.sigmoid(h0)                              # SiLU (f32 VPU/EUP)

    # -------------------- Detect head, scale 0 (fused conv epilogue) ---------------------
    d0 = jnp.dot(h0.astype(jnp.bfloat16), wd0_ref[...],
                 preferred_element_type=jnp.float32) + bd0_ref[...]
    det0_ref[0] = d0.astype(det0_ref.dtype)                   # lane-dense (4*G*G, 128) store

    # -------- stash padded f0 in VMEM (pair-parity grouped) for conv1; never hits HBM ----
    # f0_ref[p, q, u, v, c] = f0_pad[2u+p, 2v+q, c]
    f0_ref[...] = jnp.zeros(f0_ref.shape, f0_ref.dtype)
    for a in range(2):
        for b in range(2):
            g = a * 2 + b
            u0, p = (a + 1) // 2, (a + 1) % 2
            v0, q = (b + 1) // 2, (b + 1) % 2
            for ip in range(G):
                row = h0[(g * G + ip) * G:(g * G + ip + 1) * G, :]      # (G, c0)
                f0_ref[p:p + 1, q:q + 1, u0 + ip:u0 + ip + 1, v0:v0 + G, :] = (
                    row.reshape(1, 1, 1, G, c0))

    # ----------------------------- conv1: 3x3 / s2 + SiLU --------------------------------
    f0 = f0_ref[...]                                          # (2, 2, G+1, G+1, c0) f32
    taps = []
    for di in range(3):
        for dj in range(3):
            taps.append(f0[di % 2, dj % 2,
                           di // 2:di // 2 + G,
                           dj // 2:dj // 2 + G, :])           # (G, G, c0), unit-offset slices
    im2col1 = jnp.concatenate(taps, axis=-1).reshape(G * G, 9 * c0)
    h1 = jnp.dot(im2col1.astype(jnp.bfloat16), w1_ref[...],
                 preferred_element_type=jnp.float32) + b1_ref[...]
    h1 = h1 * jax.nn.sigmoid(h1)                              # (G*G, c1) f32, raster rows

    # -------------------- Detect head, scale 1 (fused conv epilogue) ---------------------
    d1 = jnp.dot(h1.astype(jnp.bfloat16), wd1_ref[...],
                 preferred_element_type=jnp.float32) + bd1_ref[...]
    det1_ref[0] = d1.astype(det1_ref.dtype)                   # lane-dense (G*G, 128) store

    # ---------- Classify head: 1x1 Conv + SiLU -> GAP -> Linear -> masked softmax --------
    z = jnp.dot(h1.astype(jnp.bfloat16), wc_ref[...],
                preferred_element_type=jnp.float32) + bc_ref[...]
    z = z * jax.nn.sigmoid(z)                                 # (G*G, c_mid)
    pooled = jnp.sum(z, axis=0, keepdims=True) * inv_hw       # AdaptiveAvgPool2d(1)
    logits = jnp.dot(pooled.astype(jnp.bfloat16), wl_ref[...],
                     preferred_element_type=jnp.float32) + bl_ref[...]    # (1, 128)
    lane = jax.lax.broadcasted_iota(jnp.int32, logits.shape, 1)
    logits = jnp.where(lane < nc_1, logits, jnp.float32(-1e30))           # mask padded lanes
    m = jnp.max(logits, axis=-1, keepdims=True)
    e = jnp.exp(logits - m)
    d = jnp.sum(e, axis=-1, keepdims=True)
    r = pl.reciprocal(d, approx=True)                         # EUP slot
    r = r * (2.0 - d * r)                                     # one Newton step (~1e-7 rel err)
    cls_ref[0] = (e * r).astype(cls_ref.dtype)


def multimodel_pallas(xq, params, *, cin, nc_1, gsz):
    """Single fused pallas_call for the whole forward. xq: (B, G+1, 4, G+1, 4*cin) f32."""
    (w0, b0, w1, b1, wd0, bd0, wd1, bd1, wc, bc, wl, bl) = params
    B = xq.shape[0]
    c0 = w0.shape[-1]
    nq = gsz + 1

    def full(shape):
        return pl.BlockSpec(shape, lambda b: (0, 0))

    kernel = functools.partial(_multimodel_kernel, cin=cin, c0=c0, nc_1=nc_1,
                               gsz=gsz, inv_hw=1.0 / float(gsz * gsz))
    return pl.pallas_call(
        kernel,
        grid=(B,),
        out_shape=(
            jax.ShapeDtypeStruct((B, 4 * gsz * gsz, 128), jnp.bfloat16),   # detect scale 0
            jax.ShapeDtypeStruct((B, gsz * gsz, 128), jnp.bfloat16),       # detect scale 1
            jax.ShapeDtypeStruct((B, 1, 128), jnp.float32),                # classification
        ),
        in_specs=[
            pl.BlockSpec((1, nq, 4, nq, 4 * cin), lambda b: (b, 0, 0, 0, 0)),
            full(w0.shape), full(b0.shape),
            full(w1.shape), full(b1.shape),
            full(wd0.shape), full(bd0.shape),
            full(wd1.shape), full(bd1.shape),
            full(wc.shape), full(bc.shape),
            full(wl.shape), full(bl.shape),
        ],
        out_specs=(
            pl.BlockSpec((1, 4 * gsz * gsz, 128), lambda b: (b, 0, 0)),
            pl.BlockSpec((1, gsz * gsz, 128), lambda b: (b, 0, 0)),
            pl.BlockSpec((1, 1, 128), lambda b: (b, 0, 0)),
        ),
        scratch_shapes=[pltpu.VMEM((2, 2, nq, nq, c0), jnp.float32)],       # padded f0
        compiler_params=pltpu.CompilerParams(
            dimension_semantics=("parallel",),        # one image per grid step / per TC
            vmem_limit_bytes=_VMEM_LIMIT),
    )(xq, w0, b0, w1, b1, wd0, bd0, wd1, bd1, wc, bc, wl, bl)


# ------------------------------------ MultiModel --------------------------------------

class MultiModelPallas:
    """Tiny deterministic instance of the MultiModel family (Detect + Classify)."""

    def __init__(self, key, ch=2, nc=3, nc_1=5, reg_max=4):
        self.ch, self.nc, self.nc_1, self.reg_max = ch, nc, nc_1, reg_max
        self.no = 4 * reg_max + nc
        # BN folded with default running stats (mean=0, var=1, eps=1e-3 from initialize_weights)
        bn_scale = 1.0 / jnp.sqrt(1.0 + 1e-3)
        keys = jax.random.split(key, 8)

        def w(k_, shape, scale=0.1):
            return jax.random.normal(k_, shape, jnp.float32) * scale

        # backbone Conv(3x3, s=2) blocks; conv has no bias (BN beta=0); weights pre-reshaped
        # to (9*cin, cout) so the kernel never slices per-tap weights.
        w0 = (w(keys[0], (3, 3, ch, 16)) * bn_scale).reshape(9 * ch, 16)
        w1 = (w(keys[1], (3, 3, 16, 32)) * bn_scale).reshape(9 * 16, 32)
        b0 = jnp.zeros((1, 16), jnp.float32)
        b1 = jnp.zeros((1, 32), jnp.float32)

        # Detect head: per-scale fused [box | cls] 1x1 conv, zero-padded to 128 output lanes
        c_box = 4 * reg_max

        def detect_params(kb, kc, cin):
            wb = w(kb, (cin, c_box))
            bb = jnp.full((c_box,), 1.0, jnp.float32)        # Detect.bias_init-style box bias
            wc_ = w(kc, (cin, nc))
            bc_ = jnp.full((nc,), -5.0, jnp.float32)         # Detect.bias_init-style cls bias
            wd = jnp.concatenate([wb, wc_], axis=-1)
            bd = jnp.concatenate([bb, bc_], axis=0)
            wdp = jnp.zeros((cin, 128), jnp.float32).at[:, :self.no].set(wd)
            bdp = jnp.zeros((1, 128), jnp.float32).at[0, :self.no].set(bd)
            return wdp.astype(jnp.bfloat16), bdp

        wd0, bd0 = detect_params(keys[2], keys[3], 16)
        wd1, bd1 = detect_params(keys[4], keys[5], 32)

        # Classify head: Conv(32->64)+SiLU -> GAP -> Linear(64->nc_1, padded to 128) -> softmax
        wc = (w(keys[6], (1, 1, 32, 64)) * bn_scale).reshape(32, 64)
        bc = jnp.zeros((1, 64), jnp.float32)
        wl = w(keys[7], (64, nc_1))
        wlp = jnp.zeros((64, 128), jnp.float32).at[:, :nc_1].set(wl)
        blp = jnp.zeros((1, 128), jnp.float32)

        self.params = (w0.astype(jnp.bfloat16), b0, w1.astype(jnp.bfloat16), b1,
                       wd0, bd0, wd1, bd1,
                       wc.astype(jnp.bfloat16), bc, wlp.astype(jnp.bfloat16), blp)
        self._jit_forward = jax.jit(self._forward)

    def _forward(self, x_nchw):
        B, C, H, W = x_nchw.shape
        assert H == W and H % 4 == 0, "toy config supports square inputs with H % 4 == 0"
        G = H // 4                       # conv1 output side (== conv0 output side // 2)
        nq = G + 1
        no = self.no

        # PyTorch-semantics boundary: NCHW in, autopad(1) + pad up to a multiple of 4, then a
        # PURE row-major regroup into quad-parity form (no data duplication / plane stacking;
        # the extra pad rows/cols are never read by any tap).
        x = jnp.transpose(x_nchw, (0, 2, 3, 1)).astype(jnp.float32)
        xpad = jnp.pad(x, ((0, 0), (1, 4 * nq - H - 1), (1, 4 * nq - W - 1), (0, 0)))
        xq = xpad.reshape(B, nq, 4, nq, 4 * C)

        det0, det1, cls = multimodel_pallas(xq, self.params, cin=C, nc_1=self.nc_1, gsz=G)

        # Un-pad channels + restore PyTorch NCHW layout (tiny per-scale maps).
        # detect scale 0 rows are ordered (a, b, ip, jp) with (i0, j0) = (2*ip + a, 2*jp + b).
        d0 = det0[..., :no].reshape(B, 2, 2, G, G, no)
        d0 = jnp.transpose(d0, (0, 5, 3, 1, 4, 2)).reshape(B, no, 2 * G, 2 * G)
        d1 = det1[..., :no].reshape(B, G, G, no)
        d1 = jnp.transpose(d1, (0, 3, 1, 2))
        classification = cls[:, 0, :self.nc_1]

        # MultiBaseModel.combine_results
        return {'detection': [d0, d1], 'classification': classification}

    def forward(self, x_nchw):
        return self._jit_forward(x_nchw)


# --------------------------------------- main ------------------------------------------

if __name__ == "__main__":
    key = jax.random.PRNGKey(0)
    k_param, k_in = jax.random.split(key)

    B, CH, S = 2, 2, 16                       # input: (2, 2, 16, 16) NCHW (module default ch=2)
    x = jax.random.normal(k_in, (B, CH, S, S), jnp.float32)

    model = MultiModelPallas(k_param, ch=CH, nc=3, nc_1=5, reg_max=4)
    out = model.forward(x)
    out = jax.block_until_ready(out)

    det, cls = out['detection'], out['classification']
    assert len(det) == 2
    assert det[0].shape == (B, 4 * 4 + 3, S // 2, S // 2)
    assert det[1].shape == (B, 4 * 4 + 3, S // 4, S // 4)
    assert cls.shape == (B, 5)
    assert jnp.allclose(jnp.sum(cls.astype(jnp.float32), axis=-1), 1.0, atol=1e-5)
    assert all(bool(jnp.all(jnp.isfinite(d.astype(jnp.float32)))) for d in det)
    assert bool(jnp.all(jnp.isfinite(cls)))

    print("KERNEL_OK")
</pallas_src>

<mosaic_0001>
module attributes {stable_mosaic.version = 11 : i64} {
  func.func @_multimodel_kernel(%arg0: i32, %arg1: memref<1x5x4x5x8xf32, #tpu.memory_space<vmem>>, %arg2: memref<18x16xbf16, #tpu.memory_space<vmem>>, %arg3: memref<1x16xf32, #tpu.memory_space<vmem>>, %arg4: memref<144x32xbf16, #tpu.memory_space<vmem>>, %arg5: memref<1x32xf32, #tpu.memory_space<vmem>>, %arg6: memref<16x128xbf16, #tpu.memory_space<vmem>>, %arg7: memref<1x128xf32, #tpu.memory_space<vmem>>, %arg8: memref<32x128xbf16, #tpu.memory_space<vmem>>, %arg9: memref<1x128xf32, #tpu.memory_space<vmem>>, %arg10: memref<32x64xbf16, #tpu.memory_space<vmem>>, %arg11: memref<1x64xf32, #tpu.memory_space<vmem>>, %arg12: memref<64x128xbf16, #tpu.memory_space<vmem>>, %arg13: memref<1x128xf32, #tpu.memory_space<vmem>>, %arg14: memref<1x64x128xbf16, #tpu.memory_space<vmem>>, %arg15: memref<1x16x128xbf16, #tpu.memory_space<vmem>>, %arg16: memref<1x1x128xf32, #tpu.memory_space<vmem>>, %arg17: memref<2x2x5x5x16xf32, #tpu.memory_space<vmem>>) attributes {dimension_semantics = [#tpu.dimension_semantics<parallel>], iteration_bounds = array<i64: 2>, scalar_prefetch = 0 : i64, scratch_operands = 1 : i64, tpu.core_type = #tpu.core_type<tc>, window_params = [{transform_indices = @transform_0, window_bounds = array<i64: 1, 5, 4, 5, 8>}, {pipeline_mode = #tpu.pipeline_mode<synchronous>, transform_indices = @transform_1, window_bounds = array<i64: 18, 16>}, {pipeline_mode = #tpu.pipeline_mode<synchronous>, transform_indices = @transform_2, window_bounds = array<i64: 1, 16>}, {pipeline_mode = #tpu.pipeline_mode<synchronous>, transform_indices = @transform_3, window_bounds = array<i64: 144, 32>}, {pipeline_mode = #tpu.pipeline_mode<synchronous>, transform_indices = @transform_4, window_bounds = array<i64: 1, 32>}, {pipeline_mode = #tpu.pipeline_mode<synchronous>, transform_indices = @transform_5, window_bounds = array<i64: 16, 128>}, {pipeline_mode = #tpu.pipeline_mode<synchronous>, transform_indices = @transform_6, window_bounds = array<i64: 1, 128>}, {pipeline_mode = #tpu.pipeline_mode<synchronous>, transform_indices = @transform_7, window_bounds = array<i64: 32, 128>}, {pipeline_mode = #tpu.pipeline_mode<synchronous>, transform_indices = @transform_8, window_bounds = array<i64: 1, 128>}, {pipeline_mode = #tpu.pipeline_mode<synchronous>, transform_indices = @transform_9, window_bounds = array<i64: 32, 64>}, {pipeline_mode = #tpu.pipeline_mode<synchronous>, transform_indices = @transform_10, window_bounds = array<i64: 1, 64>}, {pipeline_mode = #tpu.pipeline_mode<synchronous>, transform_indices = @transform_11, window_bounds = array<i64: 64, 128>}, {pipeline_mode = #tpu.pipeline_mode<synchronous>, transform_indices = @transform_12, window_bounds = array<i64: 1, 128>}, {transform_indices = @transform_13, window_bounds = array<i64: 1, 64, 128>}, {transform_indices = @transform_14, window_bounds = array<i64: 1, 16, 128>}, {transform_indices = @transform_15, window_bounds = array<i64: 1, 1, 128>}]} {
    %c0 = arith.constant 0 : index
    %c0_0 = arith.constant 0 : index
    %c0_1 = arith.constant 0 : index
    %c0_2 = arith.constant 0 : index
    %c0_3 = arith.constant 0 : index
    %0 = vector.load %arg1[%c0, %c0_0, %c0_1, %c0_2, %c0_3] : memref<1x5x4x5x8xf32, #tpu.memory_space<vmem>>, vector<1x5x4x5x8xf32>
    %1 = vector.shape_cast %0 : vector<1x5x4x5x8xf32> to vector<5x4x5x8xf32>
    %2 = vector.extract_strided_slice %1 {offsets = [0, 0, 0, 0], sizes = [4, 1, 4, 2], strides = [1, 1, 1, 1]} : vector<5x4x5x8xf32> to vector<4x1x4x2xf32>
    %3 = vector.shape_cast %2 : vector<4x1x4x2xf32> to vector<4x4x2xf32>
    %4 = vector.extract_strided_slice %1 {offsets = [0, 0, 0, 2], sizes = [4, 1, 4, 2], strides = [1, 1, 1, 1]} : vector<5x4x5x8xf32> to vector<4x1x4x2xf32>
    %5 = vector.shape_cast %4 : vector<4x1x4x2xf32> to vector<4x4x2xf32>
    %6 = vector.extract_strided_slice %1 {offsets = [0, 0, 0, 4], sizes = [4, 1, 4, 2], strides = [1, 1, 1, 1]} : vector<5x4x5x8xf32> to vector<4x1x4x2xf32>
    %7 = vector.shape_cast %6 : vector<4x1x4x2xf32> to vector<4x4x2xf32>
    %8 = vector.extract_strided_slice %1 {offsets = [0, 1, 0, 0], sizes = [4, 1, 4, 2], strides = [1, 1, 1, 1]} : vector<5x4x5x8xf32> to vector<4x1x4x2xf32>
    %9 = vector.shape_cast %8 : vector<4x1x4x2xf32> to vector<4x4x2xf32>
    %10 = vector.extract_strided_slice %1 {offsets = [0, 1, 0, 2], sizes = [4, 1, 4, 2], strides = [1, 1, 1, 1]} : vector<5x4x5x8xf32> to vector<4x1x4x2xf32>
    %11 = vector.shape_cast %10 : vector<4x1x4x2xf32> to vector<4x4x2xf32>
    %12 = vector.extract_strided_slice %1 {offsets = [0, 1, 0, 4], sizes = [4, 1, 4, 2], strides = [1, 1, 1, 1]} : vector<5x4x5x8xf32> to vector<4x1x4x2xf32>
    %13 = vector.shape_cast %12 : vector<4x1x4x2xf32> to vector<4x4x2xf32>
    %14 = vector.extract_strided_slice %1 {offsets = [0, 2, 0, 0], sizes = [4, 1, 4, 2], strides = [1, 1, 1, 1]} : vector<5x4x5x8xf32> to vector<4x1x4x2xf32>
    %15 = vector.shape_cast %14 : vector<4x1x4x2xf32> to vector<4x4x2xf32>
    %16 = vector.extract_strided_slice %1 {offsets = [0, 2, 0, 2], sizes = [4, 1, 4, 2], strides = [1, 1, 1, 1]} : vector<5x4x5x8xf32> to vector<4x1x4x2xf32>
    %17 = vector.shape_cast %16 : vector<4x1x4x2xf32> to vector<4x4x2xf32>
    %18 = vector.extract_strided_slice %1 {offsets = [0, 2, 0, 4], sizes = [4, 1, 4, 2], strides = [1, 1, 1, 1]} : vector<5x4x5x8xf32> to vector<4x1x4x2xf32>
    %19 = vector.shape_cast %18 : vector<4x1x4x2xf32> to vector<4x4x2xf32>
    %20 = tpu.concatenate %3, %5, %7, %9, %11, %13, %15, %17, %19 in 2 : vector<4x4x2xf32>, vector<4x4x2xf32>, vector<4x4x2xf32>, vector<4x4x2xf32>, vector<4x4x2xf32>, vector<4x4x2xf32>, vector<4x4x2xf32>, vector<4x4x2xf32>, vector<4x4x2xf32> -> vector<4x4x18xf32>
    %21 = vector.shape_cast %20 : vector<4x4x18xf32> to vector<16x18xf32>
    %22 = vector.extract_strided_slice %1 {offsets = [0, 0, 0, 4], sizes = [4, 1, 4, 2], strides = [1, 1, 1, 1]} : vector<5x4x5x8xf32> to vector<4x1x4x2xf32>
    %23 = vector.shape_cast %22 : vector<4x1x4x2xf32> to vector<4x4x2xf32>
    %24 = vector.extract_strided_slice %1 {offsets = [0, 0, 0, 6], sizes = [4, 1, 4, 2], strides = [1, 1, 1, 1]} : vector<5x4x5x8xf32> to vector<4x1x4x2xf32>
    %25 = vector.shape_cast %24 : vector<4x1x4x2xf32> to vector<4x4x2xf32>
    %26 = vector.extract_strided_slice %1 {offsets = [0, 0, 1, 0], sizes = [4, 1, 4, 2], strides = [1, 1, 1, 1]} : vector<5x4x5x8xf32> to vector<4x1x4x2xf32>
    %27 = vector.shape_cast %26 : vector<4x1x4x2xf32> to vector<4x4x2xf32>
    %28 = vector.extract_strided_slice %1 {offsets = [0, 1, 0, 4], sizes = [4, 1, 4, 2], strides = [1, 1, 1, 1]} : vector<5x4x5x8xf32> to vector<4x1x4x2xf32>
    %29 = vector.shape_cast %28 : vector<4x1x4x2xf32> to vector<4x4x2xf32>
    %30 = vector.extract_strided_slice %1 {offsets = [0, 1, 0, 6], sizes = [4, 1, 4, 2], strides = [1, 1, 1, 1]} : vector<5x4x5x8xf32> to vector<4x1x4x2xf32>
    %31 = vector.shape_cast %30 : vector<4x1x4x2xf32> to vector<4x4x2xf32>
    %32 = vector.extract_strided_slice %1 {offsets = [0, 1, 1, 0], sizes = [4, 1, 4, 2], strides = [1, 1, 1, 1]} : vector<5x4x5x8xf32> to vector<4x1x4x2xf32>
    %33 = vector.shape_cast %32 : vector<4x1x4x2xf32> to vector<4x4x2xf32>
    %34 = vector.extract_strided_slice %1 {offsets = [0, 2, 0, 4], sizes = [4, 1, 4, 2], strides = [1, 1, 1, 1]} : vector<5x4x5x8xf32> to vector<4x1x4x2xf32>
    %35 = vector.shape_cast %34 : vector<4x1x4x2xf32> to vector<4x4x2xf32>
    %36 = vector.extract_strided_slice %1 {offsets = [0, 2, 0, 6], sizes = [4, 1, 4, 2], strides = [1, 1, 1, 1]} : vector<5x4x5x8xf32> to vector<4x1x4x2xf32>
    %37 = vector.shape_cast %36 : vector<4x1x4x2xf32> to vector<4x4x2xf32>
    %38 = vector.extract_strided_slice %1 {offsets = [0, 2, 1, 0], sizes = [4, 1, 4, 2], strides = [1, 1, 1, 1]} : vector<5x4x5x8xf32> to vector<4x1x4x2xf32>
    %39 = vector.shape_cast %38 : vector<4x1x4x2xf32> to vector<4x4x2xf32>
    %40 = tpu.concatenate %23, %25, %27, %29, %31, %33, %35, %37, %39 in 2 : vector<4x4x2xf32>, vector<4x4x2xf32>, vector<4x4x2xf32>, vector<4x4x2xf32>, vector<4x4x2xf32>, vector<4x4x2xf32>, vector<4x4x2xf32>, vector<4x4x2xf32>, vector<4x4x2xf32> -> vector<4x4x18xf32>
    %41 = vector.shape_cast %40 : vector<4x4x18xf32> to vector<16x18xf32>
    %42 = vector.extract_strided_slice %1 {offsets = [0, 2, 0, 0], sizes = [4, 1, 4, 2], strides = [1, 1, 1, 1]} : vector<5x4x5x8xf32> to vector<4x1x4x2xf32>
    %43 = vector.shape_cast %42 : vector<4x1x4x2xf32> to vector<4x4x2xf32>
    %44 = vector.extract_strided_slice %1 {offsets = [0, 2, 0, 2], sizes = [4, 1, 4, 2], strides = [1, 1, 1, 1]} : vector<5x4x5x8xf32> to vector<4x1x4x2xf32>
    %45 = vector.shape_cast %44 : vector<4x1x4x2xf32> to vector<4x4x2xf32>
    %46 = vector.extract_strided_slice %1 {offsets = [0, 2, 0, 4], sizes = [4, 1, 4, 2], strides = [1, 1, 1, 1]} : vector<5x4x5x8xf32> to vector<4x1x4x2xf32>
    %47 = vector.shape_cast %46 : vector<4x1x4x2xf32> to vector<4x4x2xf32>
    %48 = vector.extract_strided_slice %1 {offsets = [0, 3, 0, 0], sizes = [4, 1, 4, 2], strides = [1, 1, 1, 1]} : vector<5x4x5x8xf32> to vector<4x1x4x2xf32>
    %49 = vector.shape_cast %48 : vector<4x1x4x2xf32> to vector<4x4x2xf32>
    %50 = vector.extract_strided_slice %1 {offsets = [0, 3, 0, 2], sizes = [4, 1, 4, 2], strides = [1, 1, 1, 1]} : vector<5x4x5x8xf32> to vector<4x1x4x2xf32>
    %51 = vector.shape_cast %50 : vector<4x1x4x2xf32> to vector<4x4x2xf32>
    %52 = vector.extract_strided_slice %1 {offsets = [0, 3, 0, 4], sizes = [4, 1, 4, 2], strides = [1, 1, 1, 1]} : vector<5x4x5x8xf32> to vector<4x1x4x2xf32>
    %53 = vector.shape_cast %52 : vector<4x1x4x2xf32> to vector<4x4x2xf32>
    %54 = vector.extract_strided_slice %1 {offsets = [1, 0, 0, 0], sizes = [4, 1, 4, 2], strides = [1, 1, 1, 1]} : vector<5x4x5x8xf32> to vector<4x1x4x2xf32>
    %55 = vector.shape_cast %54 : vector<4x1x4x2xf32> to vector<4x4x2xf32>
    %56 = vector.extract_strided_slice %1 {offsets = [1, 0, 0, 2], sizes = [4, 1, 4, 2], strides = [1, 1, 1, 1]} : vector<5x4x5x8xf32> to vector<4x1x4x2xf32>
    %57 = vector.shape_cast %56 : vector<4x1x4x2xf32> to vector<4x4x2xf32>
    %58 = vector.extract_strided_slice %1 {offsets = [1, 0, 0, 4], sizes = [4, 1, 4, 2], strides = [1, 1, 1, 1]} : vector<5x4x5x8xf32> to vector<4x1x4x2xf32>
    %59 = vector.shape_cast %58 : vector<4x1x4x2xf32> to vector<4x4x2xf32>
    %60 = tpu.concatenate %43, %45, %47, %49, %51, %53, %55, %57, %59 in 2 : vector<4x4x2xf32>, vector<4x4x2xf32>, vector<4x4x2xf32>, vector<4x4x2xf32>, vector<4x4x2xf32>, vector<4x4x2xf32>, vector<4x4x2xf32>, vector<4x4x2xf32>, vector<4x4x2xf32> -> vector<4x4x18xf32>
    %61 = vector.shape_cast %60 : vector<4x4x18xf32> to vector<16x18xf32>
    %62 = vector.extract_strided_slice %1 {offsets = [0, 2, 0, 4], sizes = [4, 1, 4, 2], strides = [1, 1, 1, 1]} : vector<5x4x5x8xf32> to vector<4x1x4x2xf32>
    %63 = vector.shape_cast %62 : vector<4x1x4x2xf32> to vector<4x4x2xf32>
    %64 = vector.extract_strided_slice %1 {offsets = [0, 2, 0, 6], sizes = [4, 1, 4, 2], strides = [1, 1, 1, 1]} : vector<5x4x5x8xf32> to vector<4x1x4x2xf32>
    %65 = vector.shape_cast %64 : vector<4x1x4x2xf32> to vector<4x4x2xf32>
    %66 = vector.extract_strided_slice %1 {offsets = [0, 2, 1, 0], sizes = [4, 1, 4, 2], strides = [1, 1, 1, 1]} : vector<5x4x5x8xf32> to vector<4x1x4x2xf32>
    %67 = vector.shape_cast %66 : vector<4x1x4x2xf32> to vector<4x4x2xf32>
    %68 = vector.extract_strided_slice %1 {offsets = [0, 3, 0, 4], sizes = [4, 1, 4, 2], strides = [1, 1, 1, 1]} : vector<5x4x5x8xf32> to vector<4x1x4x2xf32>
    %69 = vector.shape_cast %68 : vector<4x1x4x2xf32> to vector<4x4x2xf32>
    %70 = vector.extract_strided_slice %1 {offsets = [0, 3, 0, 6], sizes = [4, 1, 4, 2], strides = [1, 1, 1, 1]} : vector<5x4x5x8xf32> to vector<4x1x4x2xf32>
    %71 = vector.shape_cast %70 : vector<4x1x4x2xf32> to vector<4x4x2xf32>
    %72 = vector.extract_strided_slice %1 {offsets = [0, 3, 1, 0], sizes = [4, 1, 4, 2], strides = [1, 1, 1, 1]} : vector<5x4x5x8xf32> to vector<4x1x4x2xf32>
    %73 = vector.shape_cast %72 : vector<4x1x4x2xf32> to vector<4x4x2xf32>
    %74 = vector.extract_strided_slice %1 {offsets = [1, 0, 0, 4], sizes = [4, 1, 4, 2], strides = [1, 1, 1, 1]} : vector<5x4x5x8xf32> to vector<4x1x4x2xf32>
    %75 = vector.shape_cast %74 : vector<4x1x4x2xf32> to vector<4x4x2xf32>
    %76 = vector.extract_strided_slice %1 {offsets = [1, 0, 0, 6], sizes = [4, 1, 4, 2], strides = [1, 1, 1, 1]} : vector<5x4x5x8xf32> to vector<4x1x4x2xf32>
    %77 = vector.shape_cast %76 : vector<4x1x4x2xf32> to vector<4x4x2xf32>
    %78 = vector.extract_strided_slice %1 {offsets = [1, 0, 1, 0], sizes = [4, 1, 4, 2], strides = [1, 1, 1, 1]} : vector<5x4x5x8xf32> to vector<4x1x4x2xf32>
    %79 = vector.shape_cast %78 : vector<4x1x4x2xf32> to vector<4x4x2xf32>
    %80 = tpu.concatenate %63, %65, %67, %69, %71, %73, %75, %77, %79 in 2 : vector<4x4x2xf32>, vector<4x4x2xf32>, vector<4x4x2xf32>, vector<4x4x2xf32>, vector<4x4x2xf32>, vector<4x4x2xf32>, vector<4x4x2xf32>, vector<4x4x2xf32>, vector<4x4x2xf32> -> vector<4x4x18xf32>
    %81 = vector.shape_cast %80 : vector<4x4x18xf32> to vector<16x18xf32>
    %82 = tpu.concatenate %21, %41, %61, %81 in 0 : vector<16x18xf32>, vector<16x18xf32>, vector<16x18xf32>, vector<16x18xf32> -> vector<64x18xf32>
    %83 = arith.truncf %82 : vector<64x18xf32> to vector<64x18xbf16>
    %c0_4 = arith.constant 0 : index
    %c0_5 = arith.constant 0 : index
    %84 = vector.load %arg2[%c0_4, %c0_5] : memref<18x16xbf16, #tpu.memory_space<vmem>>, vector<18x16xbf16>
    %cst = arith.constant dense<0.000000e+00> : vector<64x16xf32>
    %85 = tpu.matmul %83, %84, %cst {dimension_numbers = #tpu.dot_dimension_numbers<[1], [0], [0], [1], [0, 0, 1, 1], [], []>} : vector<64x18xbf16>, vector<18x16xbf16>, vector<64x16xf32> -> vector<64x16xf32>
    %c0_6 = arith.constant 0 : index
    %c0_7 = arith.constant 0 : index
    %86 = vector.load %arg3[%c0_6, %c0_7] : memref<1x16xf32, #tpu.memory_space<vmem>>, vector<1x16xf32>
    %87 = vector.broadcast %86 : vector<1x16xf32> to vector<64x16xf32>
    %88 = arith.addf %85, %87 : vector<64x16xf32>
    %89 = arith.negf %88 : vector<64x16xf32>
    %90 = math.exp %89 : vector<64x16xf32>
    %cst_8 = arith.constant 1.000000e+00 : f32
    %91 = vector.broadcast %cst_8 : f32 to vector<64x16xf32>
    %92 = arith.addf %91, %90 : vector<64x16xf32>
    %93 = arith.divf %91, %92 : vector<64x16xf32>
    %94 = arith.mulf %88, %93 : vector<64x16xf32>
    %95 = arith.truncf %94 : vector<64x16xf32> to vector<64x16xbf16>
    %c0_9 = arith.constant 0 : index
    %c0_10 = arith.constant 0 : index
    %96 = vector.load %arg6[%c0_9, %c0_10] : memref<16x128xbf16, #tpu.memory_space<vmem>>, vector<16x128xbf16>
    %cst_11 = arith.constant dense<0.000000e+00> : vector<64x128xf32>
    %97 = tpu.matmul %95, %96, %cst_11 {dimension_numbers = #tpu.dot_dimension_numbers<[1], [0], [0], [1], [0, 0, 1, 1], [], []>} : vector<64x16xbf16>, vector<16x128xbf16>, vector<64x128xf32> -> vector<64x128xf32>
    %c0_12 = arith.constant 0 : index
    %c0_13 = arith.constant 0 : index
    %98 = vector.load %arg7[%c0_12, %c0_13] : memref<1x128xf32, #tpu.memory_space<vmem>>, vector<1x128xf32>
    %99 = vector.broadcast %98 : vector<1x128xf32> to vector<64x128xf32>
    %100 = arith.addf %97, %99 : vector<64x128xf32>
    %101 = arith.truncf %100 : vector<64x128xf32> to vector<64x128xbf16>
    %c0_14 = arith.constant 0 : index
    %c0_15 = arith.constant 0 : index
    %c0_16 = arith.constant 0 : index
    %102 = vector.load %arg14[%c0_14, %c0_15, %c0_16] : memref<1x64x128xbf16, #tpu.memory_space<vmem>>, vector<1x64x128xbf16>
    %103 = vector.shape_cast %102 : vector<1x64x128xbf16> to vector<64x128xbf16>
    %104 = vector.shape_cast %101 : vector<64x128xbf16> to vector<1x64x128xbf16>
    tpu.vector_store %arg14[%c0_14, %c0_15, %c0_16], %104 {strides = array<i32>} : memref<1x64x128xbf16, #tpu.memory_space<vmem>>, vector<1x64x128xbf16>,
    %cst_17 = arith.constant 0.000000e+00 : f32
    %105 = vector.broadcast %cst_17 : f32 to vector<2x2x5x5x16xf32>
    %c0_18 = arith.constant 0 : index
    %c0_19 = arith.constant 0 : index
    %c0_20 = arith.constant 0 : index
    %c0_21 = arith.constant 0 : index
    %c0_22 = arith.constant 0 : index
    %106 = vector.load %arg17[%c0_18, %c0_19, %c0_20, %c0_21, %c0_22] : memref<2x2x5x5x16xf32, #tpu.memory_space<vmem>>, vector<2x2x5x5x16xf32>
    tpu.vector_store %arg17[%c0_18, %c0_19, %c0_20, %c0_21, %c0_22], %105 {strides = array<i32>} : memref<2x2x5x5x16xf32, #tpu.memory_space<vmem>>, vector<2x2x5x5x16xf32>,
    %107 = vector.extract_strided_slice %94 {offsets = [0, 0], sizes = [4, 16], strides = [1, 1]} : vector<64x16xf32> to vector<4x16xf32>
    %108 = vector.shape_cast %107 : vector<4x16xf32> to vector<1x1x1x4x16xf32>
    %c1 = arith.constant 1 : index
    %c1_23 = arith.constant 1 : index
    %c0_24 = arith.constant 0 : index
    %c0_25 = arith.constant 0 : index
    %c0_26 = arith.constant 0 : index
    %109 = vector.load %arg17[%c1, %c1_23, %c0_24, %c0_25, %c0_26] : memref<2x2x5x5x16xf32, #tpu.memory_space<vmem>>, vector<1x1x1x4x16xf32>
    tpu.vector_store %arg17[%c1, %c1_23, %c0_24, %c0_25, %c0_26], %108 {strides = array<i32>} : memref<2x2x5x5x16xf32, #tpu.memory_space<vmem>>, vector<1x1x1x4x16xf32>,
    %110 = vector.extract_strided_slice %94 {offsets = [4, 0], sizes = [4, 16], strides = [1, 1]} : vector<64x16xf32> to vector<4x16xf32>
    %111 = vector.shape_cast %110 : vector<4x16xf32> to vector<1x1x1x4x16xf32>
    %c1_27 = arith.constant 1 : index
    %c1_28 = arith.constant 1 : index
    %c1_29 = arith.constant 1 : index
    %c0_30 = arith.constant 0 : index
    %c0_31 = arith.constant 0 : index
    %112 = vector.load %arg17[%c1_27, %c1_28, %c1_29, %c0_30, %c0_31] : memref<2x2x5x5x16xf32, #tpu.memory_space<vmem>>, vector<1x1x1x4x16xf32>
    tpu.vector_store %arg17[%c1_27, %c1_28, %c1_29, %c0_30, %c0_31], %111 {strides = array<i32>} : memref<2x2x5x5x16xf32, #tpu.memory_space<vmem>>, vector<1x1x1x4x16xf32>,
    %113 = vector.extract_strided_slice %94 {offsets = [8, 0], sizes = [4, 16], strides = [1, 1]} : vector<64x16xf32> to vector<4x16xf32>
    %114 = vector.shape_cast %113 : vector<4x16xf32> to vector<1x1x1x4x16xf32>
    %c1_32 = arith.constant 1 : index
    %c1_33 = arith.constant 1 : index
    %c2 = arith.constant 2 : index
    %c0_34 = arith.constant 0 : index
    %c0_35 = arith.constant 0 : index
    %115 = vector.load %arg17[%c1_32, %c1_33, %c2, %c0_34, %c0_35] : memref<2x2x5x5x16xf32, #tpu.memory_space<vmem>>, vector<1x1x1x4x16xf32>
    tpu.vector_store %arg17[%c1_32, %c1_33, %c2, %c0_34, %c0_35], %114 {strides = array<i32>} : memref<2x2x5x5x16xf32, #tpu.memory_space<vmem>>, vector<1x1x1x4x16xf32>,
    %116 = vector.extract_strided_slice %94 {offsets = [12, 0], sizes = [4, 16], strides = [1, 1]} : vector<64x16xf32> to vector<4x16xf32>
    %117 = vector.shape_cast %116 : vector<4x16xf32> to vector<1x1x1x4x16xf32>
    %c1_36 = arith.constant 1 : index
    %c1_37 = arith.constant 1 : index
    %c3 = arith.constant 3 : index
    %c0_38 = arith.constant 0 : index
    %c0_39 = arith.constant 0 : index
    %118 = vector.load %arg17[%c1_36, %c1_37, %c3, %c0_38, %c0_39] : memref<2x2x5x5x16xf32, #tpu.memory_space<vmem>>, vector<1x1x1x4x16xf32>
    tpu.vector_store %arg17[%c1_36, %c1_37, %c3, %c0_38, %c0_39], %117 {strides = array<i32>} : memref<2x2x5x5x16xf32, #tpu.memory_space<vmem>>, vector<1x1x1x4x16xf32>,
    %119 = vector.extract_strided_slice %94 {offsets = [16, 0], sizes = [4, 16], strides = [1, 1]} : vector<64x16xf32> to vector<4x16xf32>
    %120 = vector.shape_cast %119 : vector<4x16xf32> to vector<1x1x1x4x16xf32>
    %c1_40 = arith.constant 1 : index
    %c0_41 = arith.constant 0 : index
    %c0_42 = arith.constant 0 : index
    %c1_43 = arith.constant 1 : index
    %c0_44 = arith.constant 0 : index
    %121 = vector.load %arg17[%c1_40, %c0_41, %c0_42, %c1_43, %c0_44] : memref<2x2x5x5x16xf32, #tpu.memory_space<vmem>>, vector<1x1x1x4x16xf32>
    tpu.vector_store %arg17[%c1_40, %c0_41, %c0_42, %c1_43, %c0_44], %120 {strides = array<i32>} : memref<2x2x5x5x16xf32, #tpu.memory_space<vmem>>, vector<1x1x1x4x16xf32>,
    %122 = vector.extract_strided_slice %94 {offsets = [20, 0], sizes = [4, 16], strides = [1, 1]} : vector<64x16xf32> to vector<4x16xf32>
    %123 = vector.shape_cast %122 : vector<4x16xf32> to vector<1x1x1x4x16xf32>
    %c1_45 = arith.constant 1 : index
    %c0_46 = arith.constant 0 : index
    %c1_47 = arith.constant 1 : index
    %c1_48 = arith.constant 1 : index
    %c0_49 = arith.constant 0 : index
    %124 = vector.load %arg17[%c1_45, %c0_46, %c1_47, %c1_48, %c0_49] : memref<2x2x5x5x16xf32, #tpu.memory_space<vmem>>, vector<1x1x1x4x16xf32>
    tpu.vector_store %arg17[%c1_45, %c0_46, %c1_47, %c1_48, %c0_49], %123 {strides = array<i32>} : memref<2x2x5x5x16xf32, #tpu.memory_space<vmem>>, vector<1x1x1x4x16xf32>,
    %125 = vector.extract_strided_slice %94 {offsets = [24, 0], sizes = [4, 16], strides = [1, 1]} : vector<64x16xf32> to vector<4x16xf32>
    %126 = vector.shape_cast %125 : vector<4x16xf32> to vector<1x1x1x4x16xf32>
    %c1_50 = arith.constant 1 : index
    %c0_51 = arith.constant 0 : index
    %c2_52 = arith.constant 2 : index
    %c1_53 = arith.constant 1 : index
    %c0_54 = arith.constant 0 : index
    %127 = vector.load %arg17[%c1_50, %c0_51, %c2_52, %c1_53, %c0_54] : memref<2x2x5x5x16xf32, #tpu.memory_space<vmem>>, vector<1x1x1x4x16xf32>
    tpu.vector_store %arg17[%c1_50, %c0_51, %c2_52, %c1_53, %c0_54], %126 {strides = array<i32>} : memref<2x2x5x5x16xf32, #tpu.memory_space<vmem>>, vector<1x1x1x4x16xf32>,
    %128 = vector.extract_strided_slice %94 {offsets = [28, 0], sizes = [4, 16], strides = [1, 1]} : vector<64x16xf32> to vector<4x16xf32>
    %129 = vector.shape_cast %128 : vector<4x16xf32> to vector<1x1x1x4x16xf32>
    %c1_55 = arith.constant 1 : index
    %c0_56 = arith.constant 0 : index
    %c3_57 = arith.constant 3 : index
    %c1_58 = arith.constant 1 : index
    %c0_59 = arith.constant 0 : index
    %130 = vector.load %arg17[%c1_55, %c0_56, %c3_57, %c1_58, %c0_59] : memref<2x2x5x5x16xf32, #tpu.memory_space<vmem>>, vector<1x1x1x4x16xf32>
    tpu.vector_store %arg17[%c1_55, %c0_56, %c3_57, %c1_58, %c0_59], %129 {strides = array<i32>} : memref<2x2x5x5x16xf32, #tpu.memory_space<vmem>>, vector<1x1x1x4x16xf32>,
    %131 = vector.extract_strided_slice %94 {offsets = [32, 0], sizes = [4, 16], strides = [1, 1]} : vector<64x16xf32> to vector<4x16xf32>
    %132 = vector.shape_cast %131 : vector<4x16xf32> to vector<1x1x1x4x16xf32>
    %c0_60 = arith.constant 0 : index
    %c1_61 = arith.constant 1 : index
    %c1_62 = arith.constant 1 : index
    %c0_63 = arith.constant 0 : index
    %c0_64 = arith.constant 0 : index
    %133 = vector.load %arg17[%c0_60, %c1_61, %c1_62, %c0_63, %c0_64] : memref<2x2x5x5x16xf32, #tpu.memory_space<vmem>>, vector<1x1x1x4x16xf32>
    tpu.vector_store %arg17[%c0_60, %c1_61, %c1_62, %c0_63, %c0_64], %132 {strides = array<i32>} : memref<2x2x5x5x16xf32, #tpu.memory_space<vmem>>, vector<1x1x1x4x16xf32>,
    %134 = vector.extract_strided_slice %94 {offsets = [36, 0], sizes = [4, 16], strides = [1, 1]} : vector<64x16xf32> to vector<4x16xf32>
    %135 = vector.shape_cast %134 : vector<4x16xf32> to vector<1x1x1x4x16xf32>
    %c0_65 = arith.constant 0 : index
    %c1_66 = arith.constant 1 : index
    %c2_67 = arith.constant 2 : index
    %c0_68 = arith.constant 0 : index
    %c0_69 = arith.constant 0 : index
    %136 = vector.load %arg17[%c0_65, %c1_66, %c2_67, %c0_68, %c0_69] : memref<2x2x5x5x16xf32, #tpu.memory_space<vmem>>, vector<1x1x1x4x16xf32>
    tpu.vector_store %arg17[%c0_65, %c1_66, %c2_67, %c0_68, %c0_69], %135 {strides = array<i32>} : memref<2x2x5x5x16xf32, #tpu.memory_space<vmem>>, vector<1x1x1x4x16xf32>,
    %137 = vector.extract_strided_slice %94 {offsets = [40, 0], sizes = [4, 16], strides = [1, 1]} : vector<64x16xf32> to vector<4x16xf32>
    %138 = vector.shape_cast %137 : vector<4x16xf32> to vector<1x1x1x4x16xf32>
    %c0_70 = arith.constant 0 : index
    %c1_71 = arith.constant 1 : index
    %c3_72 = arith.constant 3 : index
    %c0_73 = arith.constant 0 : index
    %c0_74 = arith.constant 0 : index
    %139 = vector.load %arg17[%c0_70, %c1_71, %c3_72, %c0_73, %c0_74] : memref<2x2x5x5x16xf32, #tpu.memory_space<vmem>>, vector<1x1x1x4x16xf32>
    tpu.vector_store %arg17[%c0_70, %c1_71, %c3_72, %c0_73, %c0_74], %138 {strides = array<i32>} : memref<2x2x5x5x16xf32, #tpu.memory_space<vmem>>, vector<1x1x1x4x16xf32>,
    %140 = vector.extract_strided_slice %94 {offsets = [44, 0], sizes = [4, 16], strides = [1, 1]} : vector<64x16xf32> to vector<4x16xf32>
    %141 = vector.shape_cast %140 : vector<4x16xf32> to vector<1x1x1x4x16xf32>
    %c0_75 = arith.constant 0 : index
    %c1_76 = arith.constant 1 : index
    %c4 = arith.constant 4 : index
    %c0_77 = arith.constant 0 : index
    %c0_78 = arith.constant 0 : index
    %142 = vector.load %arg17[%c0_75, %c1_76, %c4, %c0_77, %c0_78] : memref<2x2x5x5x16xf32, #tpu.memory_space<vmem>>, vector<1x1x1x4x16xf32>
    tpu.vector_store %arg17[%c0_75, %c1_76, %c4, %c0_77, %c0_78], %141 {strides = array<i32>} : memref<2x2x5x5x16xf32, #tpu.memory_space<vmem>>, vector<1x1x1x4x16xf32>,
    %143 = vector.extract_strided_slice %94 {offsets = [48, 0], sizes = [4, 16], strides = [1, 1]} : vector<64x16xf32> to vector<4x16xf32>
    %144 = vector.shape_cast %143 : vector<4x16xf32> to vector<1x1x1x4x16xf32>
    %c0_79 = arith.constant 0 : index
    %c0_80 = arith.constant 0 : index
    %c1_81 = arith.constant 1 : index
    %c1_82 = arith.constant 1 : index
    %c0_83 = arith.constant 0 : index
    %145 = vector.load %arg17[%c0_79, %c0_80, %c1_81, %c1_82, %c0_83] : memref<2x2x5x5x16xf32, #tpu.memory_space<vmem>>, vector<1x1x1x4x16xf32>
    tpu.vector_store %arg17[%c0_79, %c0_80, %c1_81, %c1_82, %c0_83], %144 {strides = array<i32>} : memref<2x2x5x5x16xf32, #tpu.memory_space<vmem>>, vector<1x1x1x4x16xf32>,
    %146 = vector.extract_strided_slice %94 {offsets = [52, 0], sizes = [4, 16], strides = [1, 1]} : vector<64x16xf32> to vector<4x16xf32>
    %147 = vector.shape_cast %146 : vector<4x16xf32> to vector<1x1x1x4x16xf32>
    %c0_84 = arith.constant 0 : index
    %c0_85 = arith.constant 0 : index
    %c2_86 = arith.constant 2 : index
    %c1_87 = arith.constant 1 : index
    %c0_88 = arith.constant 0 : index
    %148 = vector.load %arg17[%c0_84, %c0_85, %c2_86, %c1_87, %c0_88] : memref<2x2x5x5x16xf32, #tpu.memory_space<vmem>>, vector<1x1x1x4x16xf32>
    tpu.vector_store %arg17[%c0_84, %c0_85, %c2_86, %c1_87, %c0_88], %147 {strides = array<i32>} : memref<2x2x5x5x16xf32, #tpu.memory_space<vmem>>, vector<1x1x1x4x16xf32>,
    %149 = vector.extract_strided_slice %94 {offsets = [56, 0], sizes = [4, 16], strides = [1, 1]} : vector<64x16xf32> to vector<4x16xf32>
    %150 = vector.shape_cast %149 : vector<4x16xf32> to vector<1x1x1x4x16xf32>
    %c0_89 = arith.constant 0 : index
    %c0_90 = arith.constant 0 : index
    %c3_91 = arith.constant 3 : index
    %c1_92 = arith.constant 1 : index
    %c0_93 = arith.constant 0 : index
    %151 = vector.load %arg17[%c0_89, %c0_90, %c3_91, %c1_92, %c0_93] : memref<2x2x5x5x16xf32, #tpu.memory_space<vmem>>, vector<1x1x1x4x16xf32>
    tpu.vector_store %arg17[%c0_89, %c0_90, %c3_91, %c1_92, %c0_93], %150 {strides = array<i32>} : memref<2x2x5x5x16xf32, #tpu.memory_space<vmem>>, vector<1x1x1x4x16xf32>,
    %152 = vector.extract_strided_slice %94 {offsets = [60, 0], sizes = [4, 16], strides = [1, 1]} : vector<64x16xf32> to vector<4x16xf32>
    %153 = vector.shape_cast %152 : vector<4x16xf32> to vector<1x1x1x4x16xf32>
    %c0_94 = arith.constant 0 : index
    %c0_95 = arith.constant 0 : index
    %c4_96 = arith.constant 4 : index
    %c1_97 = arith.constant 1 : index
    %c0_98 = arith.constant 0 : index
    %154 = vector.load %arg17[%c0_94, %c0_95, %c4_96, %c1_97, %c0_98] : memref<2x2x5x5x16xf32, #tpu.memory_space<vmem>>, vector<1x1x1x4x16xf32>
    tpu.vector_store %arg17[%c0_94, %c0_95, %c4_96, %c1_97, %c0_98], %153 {strides = array<i32>} : memref<2x2x5x5x16xf32, #tpu.memory_space<vmem>>, vector<1x1x1x4x16xf32>,
    %c0_99 = arith.constant 0 : index
    %c0_100 = arith.constant 0 : index
    %c0_101 = arith.constant 0 : index
    %c0_102 = arith.constant 0 : index
    %c0_103 = arith.constant 0 : index
    %155 = vector.load %arg17[%c0_99, %c0_100, %c0_101, %c0_102, %c0_103] : memref<2x2x5x5x16xf32, #tpu.memory_space<vmem>>, vector<2x2x5x5x16xf32>
    %156 = vector.extract_strided_slice %155 {offsets = [0, 0, 0, 0, 0], sizes = [1, 1, 4, 4, 16], strides = [1, 1, 1, 1, 1]} : vector<2x2x5x5x16xf32> to vector<1x1x4x4x16xf32>
    %157 = vector.shape_cast %156 : vector<1x1x4x4x16xf32> to vector<4x4x16xf32>
    %158 = vector.extract_strided_slice %155 {offsets = [0, 1, 0, 0, 0], sizes = [1, 1, 4, 4, 16], strides = [1, 1, 1, 1, 1]} : vector<2x2x5x5x16xf32> to vector<1x1x4x4x16xf32>
    %159 = vector.shape_cast %158 : vector<1x1x4x4x16xf32> to vector<4x4x16xf32>
    %160 = vector.extract_strided_slice %155 {offsets = [0, 0, 0, 1, 0], sizes = [1, 1, 4, 4, 16], strides = [1, 1, 1, 1, 1]} : vector<2x2x5x5x16xf32> to vector<1x1x4x4x16xf32>
    %161 = vector.shape_cast %160 : vector<1x1x4x4x16xf32> to vector<4x4x16xf32>
    %162 = vector.extract_strided_slice %155 {offsets = [1, 0, 0, 0, 0], sizes = [1, 1, 4, 4, 16], strides = [1, 1, 1, 1, 1]} : vector<2x2x5x5x16xf32> to vector<1x1x4x4x16xf32>
    %163 = vector.shape_cast %162 : vector<1x1x4x4x16xf32> to vector<4x4x16xf32>
    %164 = vector.extract_strided_slice %155 {offsets = [1, 1, 0, 0, 0], sizes = [1, 1, 4, 4, 16], strides = [1, 1, 1, 1, 1]} : vector<2x2x5x5x16xf32> to vector<1x1x4x4x16xf32>
    %165 = vector.shape_cast %164 : vector<1x1x4x4x16xf32> to vector<4x4x16xf32>
    %166 = vector.extract_strided_slice %155 {offsets = [1, 0, 0, 1, 0], sizes = [1, 1, 4, 4, 16], strides = [1, 1, 1, 1, 1]} : vector<2x2x5x5x16xf32> to vector<1x1x4x4x16xf32>
    %167 = vector.shape_cast %166 : vector<1x1x4x4x16xf32> to vector<4x4x16xf32>
    %168 = vector.extract_strided_slice %155 {offsets = [0, 0, 1, 0, 0], sizes = [1, 1, 4, 4, 16], strides = [1, 1, 1, 1, 1]} : vector<2x2x5x5x16xf32> to vector<1x1x4x4x16xf32>
    %169 = vector.shape_cast %168 : vector<1x1x4x4x16xf32> to vector<4x4x16xf32>
    %170 = vector.extract_strided_slice %155 {offsets = [0, 1, 1, 0, 0], sizes = [1, 1, 4, 4, 16], strides = [1, 1, 1, 1, 1]} : vector<2x2x5x5x16xf32> to vector<1x1x4x4x16xf32>
    %171 = vector.shape_cast %170 : vector<1x1x4x4x16xf32> to vector<4x4x16xf32>
    %172 = vector.extract_strided_slice %155 {offsets = [0, 0, 1, 1, 0], sizes = [1, 1, 4, 4, 16], strides = [1, 1, 1, 1, 1]} : vector<2x2x5x5x16xf32> to vector<1x1x4x4x16xf32>
    %173 = vector.shape_cast %172 : vector<1x1x4x4x16xf32> to vector<4x4x16xf32>
    %174 = tpu.concatenate %157, %159, %161, %163, %165, %167, %169, %171, %173 in 2 : vector<4x4x16xf32>, vector<4x4x16xf32>, vector<4x4x16xf32>, vector<4x4x16xf32>, vector<4x4x16xf32>, vector<4x4x16xf32>, vector<4x4x16xf32>, vector<4x4x16xf32>, vector<4x4x16xf32> -> vector<4x4x144xf32>
    %175 = vector.shape_cast %174 : vector<4x4x144xf32> to vector<16x144xf32>
    %176 = arith.truncf %175 : vector<16x144xf32> to vector<16x144xbf16>
    %c0_104 = arith.constant 0 : index
    %c0_105 = arith.constant 0 : index
    %177 = vector.load %arg4[%c0_104, %c0_105] : memref<144x32xbf16, #tpu.memory_space<vmem>>, vector<144x32xbf16>
    %cst_106 = arith.constant dense<0.000000e+00> : vector<16x32xf32>
    %178 = tpu.matmul %176, %177, %cst_106 {dimension_numbers = #tpu.dot_dimension_numbers<[1], [0], [0], [1], [0, 0, 1, 1], [], []>} : vector<16x144xbf16>, vector<144x32xbf16>, vector<16x32xf32> -> vector<16x32xf32>
    %c0_107 = arith.constant 0 : index
    %c0_108 = arith.constant 0 : index
    %179 = vector.load %arg5[%c0_107, %c0_108] : memref<1x32xf32, #tpu.memory_space<vmem>>, vector<1x32xf32>
    %180 = vector.broadcast %179 : vector<1x32xf32> to vector<16x32xf32>
    %181 = arith.addf %178, %180 : vector<16x32xf32>
    %182 = arith.negf %181 : vector<16x32xf32>
    %183 = math.exp %182 : vector<16x32xf32>
    %cst_109 = arith.constant 1.000000e+00 : f32
    %184 = vector.broadcast %cst_109 : f32 to vector<16x32xf32>
    %185 = arith.addf %184, %183 : vector<16x32xf32>
    %186 = arith.divf %184, %185 : vector<16x32xf32>
    %187 = arith.mulf %181, %186 : vector<16x32xf32>
    %188 = arith.truncf %187 : vector<16x32xf32> to vector<16x32xbf16>
    %c0_110 = arith.constant 0 : index
    %c0_111 = arith.constant 0 : index
    %189 = vector.load %arg8[%c0_110, %c0_111] : memref<32x128xbf16, #tpu.memory_space<vmem>>, vector<32x128xbf16>
    %cst_112 = arith.constant dense<0.000000e+00> : vector<16x128xf32>
    %190 = tpu.matmul %188, %189, %cst_112 {dimension_numbers = #tpu.dot_dimension_numbers<[1], [0], [0], [1], [0, 0, 1, 1], [], []>} : vector<16x32xbf16>, vector<32x128xbf16>, vector<16x128xf32> -> vector<16x128xf32>
    %c0_113 = arith.constant 0 : index
    %c0_114 = arith.constant 0 : index
    %191 = vector.load %arg9[%c0_113, %c0_114] : memref<1x128xf32, #tpu.memory_space<vmem>>, vector<1x128xf32>
    %192 = vector.broadcast %191 : vector<1x128xf32> to vector<16x128xf32>
    %193 = arith.addf %190, %192 : vector<16x128xf32>
    %194 = arith.truncf %193 : vector<16x128xf32> to vector<16x128xbf16>
    %c0_115 = arith.constant 0 : index
    %c0_116 = arith.constant 0 : index
    %c0_117 = arith.constant 0 : index
    %195 = vector.load %arg15[%c0_115, %c0_116, %c0_117] : memref<1x16x128xbf16, #tpu.memory_space<vmem>>, vector<1x16x128xbf16>
    %196 = vector.shape_cast %195 : vector<1x16x128xbf16> to vector<16x128xbf16>
    %197 = vector.shape_cast %194 : vector<16x128xbf16> to vector<1x16x128xbf16>
    tpu.vector_store %arg15[%c0_115, %c0_116, %c0_117], %197 {strides = array<i32>} : memref<1x16x128xbf16, #tpu.memory_space<vmem>>, vector<1x16x128xbf16>,
    %198 = arith.truncf %187 : vector<16x32xf32> to vector<16x32xbf16>
    %c0_118 = arith.constant 0 : index
    %c0_119 = arith.constant 0 : index
    %199 = vector.load %arg10[%c0_118, %c0_119] : memref<32x64xbf16, #tpu.memory_space<vmem>>, vector<32x64xbf16>
    %cst_120 = arith.constant dense<0.000000e+00> : vector<16x64xf32>
    %200 = tpu.matmul %198, %199, %cst_120 {dimension_numbers = #tpu.dot_dimension_numbers<[1], [0], [0], [1], [0, 0, 1, 1], [], []>} : vector<16x32xbf16>, vector<32x64xbf16>, vector<16x64xf32> -> vector<16x64xf32>
    %c0_121 = arith.constant 0 : index
    %c0_122 = arith.constant 0 : index
    %201 = vector.load %arg11[%c0_121, %c0_122] : memref<1x64xf32, #tpu.memory_space<vmem>>, vector<1x64xf32>
    %202 = vector.broadcast %201 : vector<1x64xf32> to vector<16x64xf32>
    %203 = arith.addf %200, %202 : vector<16x64xf32>
    %204 = arith.negf %203 : vector<16x64xf32>
    %205 = math.exp %204 : vector<16x64xf32>
    %cst_123 = arith.constant 1.000000e+00 : f32
    %206 = vector.broadcast %cst_123 : f32 to vector<16x64xf32>
    %207 = arith.addf %206, %205 : vector<16x64xf32>
    %208 = arith.divf %206, %207 : vector<16x64xf32>
    %209 = arith.mulf %203, %208 : vector<16x64xf32>
    %cst_124 = arith.constant dense<0.000000e+00> : vector<64xf32>
    %210 = vector.multi_reduction <add>, %209, %cst_124 [0] : vector<16x64xf32> to vector<64xf32>
    %211 = vector.shape_cast %210 : vector<64xf32> to vector<1x64xf32>
    %cst_125 = arith.constant 6.250000e-02 : f32
    %212 = vector.broadcast %cst_125 : f32 to vector<1x64xf32>
    %213 = arith.mulf %211, %212 : vector<1x64xf32>
    %214 = arith.truncf %213 : vector<1x64xf32> to vector<1x64xbf16>
    %c0_126 = arith.constant 0 : index
    %c0_127 = arith.constant 0 : index
    %215 = vector.load %arg12[%c0_126, %c0_127] : memref<64x128xbf16, #tpu.memory_space<vmem>>, vector<64x128xbf16>
    %cst_128 = arith.constant dense<0.000000e+00> : vector<1x128xf32>
    %216 = tpu.matmul %214, %215, %cst_128 {dimension_numbers = #tpu.dot_dimension_numbers<[1], [0], [0], [1], [0, 0, 1, 1], [], []>} : vector<1x64xbf16>, vector<64x128xbf16>, vector<1x128xf32> -> vector<1x128xf32>
    %c0_129 = arith.constant 0 : index
    %c0_130 = arith.constant 0 : index
    %217 = vector.load %arg13[%c0_129, %c0_130] : memref<1x128xf32, #tpu.memory_space<vmem>>, vector<1x128xf32>
    %218 = arith.addf %216, %217 : vector<1x128xf32>
    %219 = tpu.iota {dimensions = array<i32: 1>} : vector<1x128xi32>
    %c5_i32 = arith.constant 5 : i32
    %220 = vector.broadcast %c5_i32 : i32 to vector<1x128xi32>
    %221 = arith.cmpi slt, %219, %220 : vector<1x128xi32>
    %cst_131 = arith.constant -1.000000e+30 : f32
    %222 = vector.broadcast %cst_131 : f32 to vector<1x128xf32>
    %223 = arith.select %221, %218, %222 : vector<1x128xi1>, vector<1x128xf32>
    %cst_132 = arith.constant dense<0xFF800000> : vector<1xf32>
    %224 = vector.multi_reduction <maximumf>, %223, %cst_132 [1] : vector<1x128xf32> to vector<1xf32>
    %225 = vector.shape_cast %224 : vector<1xf32> to vector<1x1xf32>
    %226 = vector.broadcast %225 : vector<1x1xf32> to vector<1x128xf32>
    %227 = arith.subf %223, %226 : vector<1x128xf32>
    %228 = math.exp %227 : vector<1x128xf32>
    %cst_133 = arith.constant dense<0.000000e+00> : vector<1xf32>
    %229 = vector.multi_reduction <add>, %228, %cst_133 [1] : vector<1x128xf32> to vector<1xf32>
    %230 = vector.shape_cast %229 : vector<1xf32> to vector<1x1xf32>
    %231 = tpu.reciprocal %230 {approx = true} : vector<1x1xf32> -> vector<1x1xf32>
    %232 = arith.mulf %230, %231 : vector<1x1xf32>
    %cst_134 = arith.constant 2.000000e+00 : f32
    %233 = vector.broadcast %cst_134 : f32 to vector<1x1xf32>
    %234 = arith.subf %233, %232 : vector<1x1xf32>
    %235 = arith.mulf %231, %234 : vector<1x1xf32>
    %236 = vector.broadcast %235 : vector<1x1xf32> to vector<1x128xf32>
    %237 = arith.mulf %228, %236 : vector<1x128xf32>
    %c0_135 = arith.constant 0 : index
    %c0_136 = arith.constant 0 : index
    %c0_137 = arith.constant 0 : index
    %238 = vector.load %arg16[%c0_135, %c0_136, %c0_137] : memref<1x1x128xf32, #tpu.memory_space<vmem>>, vector<1x1x128xf32>
    %239 = vector.shape_cast %238 : vector<1x1x128xf32> to vector<1x128xf32>
    %240 = vector.shape_cast %237 : vector<1x128xf32> to vector<1x1x128xf32>
    tpu.vector_store %arg16[%c0_135, %c0_136, %c0_137], %240 {strides = array<i32>} : memref<1x1x128xf32, #tpu.memory_space<vmem>>, vector<1x1x128xf32>,
    return
  }
  func.func @transform_0(%arg0: i32) -> (i32, i32, i32, i32, i32) {
    %c0_i32 = arith.constant 0 : i32
    %c0_i32_0 = arith.constant 0 : i32
    %c0_i32_1 = arith.constant 0 : i32
    %c0_i32_2 = arith.constant 0 : i32
    %c0_i32_3 = arith.constant 0 : i32
    return %arg0, %c0_i32, %c0_i32_0, %c0_i32_1, %c0_i32_2 : i32, i32, i32, i32, i32
  }
  func.func @transform_1(%arg0: i32) -> (i32, i32) {
    %c0_i32 = arith.constant 0 : i32
    %c0_i32_0 = arith.constant 0 : i32
    %c0_i32_1 = arith.constant 0 : i32
    return %c0_i32, %c0_i32_0 : i32, i32
  }
  func.func @transform_2(%arg0: i32) -> (i32, i32) {
    %c0_i32 = arith.constant 0 : i32
    %c0_i32_0 = arith.constant 0 : i32
    %c0_i32_1 = arith.constant 0 : i32
    return %c0_i32, %c0_i32_0 : i32, i32
  }
  func.func @transform_3(%arg0: i32) -> (i32, i32) {
    %c0_i32 = arith.constant 0 : i32
    %c0_i32_0 = arith.constant 0 : i32
    %c0_i32_1 = arith.constant 0 : i32
    return %c0_i32, %c0_i32_0 : i32, i32
  }
  func.func @transform_4(%arg0: i32) -> (i32, i32) {
    %c0_i32 = arith.constant 0 : i32
    %c0_i32_0 = arith.constant 0 : i32
    %c0_i32_1 = arith.constant 0 : i32
    return %c0_i32, %c0_i32_0 : i32, i32
  }
  func.func @transform_5(%arg0: i32) -> (i32, i32) {
    %c0_i32 = arith.constant 0 : i32
    %c0_i32_0 = arith.constant 0 : i32
    %c0_i32_1 = arith.constant 0 : i32
    return %c0_i32, %c0_i32_0 : i32, i32
  }
  func.func @transform_6(%arg0: i32) -> (i32, i32) {
    %c0_i32 = arith.constant 0 : i32
    %c0_i32_0 = arith.constant 0 : i32
    %c0_i32_1 = arith.constant 0 : i32
    return %c0_i32, %c0_i32_0 : i32, i32
  }
  func.func @transform_7(%arg0: i32) -> (i32, i32) {
    %c0_i32 = arith.constant 0 : i32
    %c0_i32_0 = arith.constant 0 : i32
    %c0_i32_1 = arith.constant 0 : i32
    return %c0_i32, %c0_i32_0 : i32, i32
  }
  func.func @transform_8(%arg0: i32) -> (i32, i32) {
    %c0_i32 = arith.constant 0 : i32
    %c0_i32_0 = arith.constant 0 : i32
    %c0_i32_1 = arith.constant 0 : i32
    return %c0_i32, %c0_i32_0 : i32, i32
  }
  func.func @transform_9(%arg0: i32) -> (i32, i32) {
    %c0_i32 = arith.constant 0 : i32
    %c0_i32_0 = arith.constant 0 : i32
    %c0_i32_1 = arith.constant 0 : i32
    return %c0_i32, %c0_i32_0 : i32, i32
  }
  func.func @transform_10(%arg0: i32) -> (i32, i32) {
    %c0_i32 = arith.constant 0 : i32
    %c0_i32_0 = arith.constant 0 : i32
    %c0_i32_1 = arith.constant 0 : i32
    return %c0_i32, %c0_i32_0 : i32, i32
  }
  func.func @transform_11(%arg0: i32) -> (i32, i32) {
    %c0_i32 = arith.constant 0 : i32
    %c0_i32_0 = arith.constant 0 : i32
    %c0_i32_1 = arith.constant 0 : i32
    return %c0_i32, %c0_i32_0 : i32, i32
  }
  func.func @transform_12(%arg0: i32) -> (i32, i32) {
    %c0_i32 = arith.constant 0 : i32
    %c0_i32_0 = arith.constant 0 : i32
    %c0_i32_1 = arith.constant 0 : i32
    return %c0_i32, %c0_i32_0 : i32, i32
  }
  func.func @transform_13(%arg0: i32) -> (i32, i32, i32) {
    %c0_i32 = arith.constant 0 : i32
    %c0_i32_0 = arith.constant 0 : i32
    %c0_i32_1 = arith.constant 0 : i32
    return %arg0, %c0_i32, %c0_i32_0 : i32, i32, i32
  }
  func.func @transform_14(%arg0: i32) -> (i32, i32, i32) {
    %c0_i32 = arith.constant 0 : i32
    %c0_i32_0 = arith.constant 0 : i32
    %c0_i32_1 = arith.constant 0 : i32
    return %arg0, %c0_i32, %c0_i32_0 : i32, i32, i32
  }
  func.func @transform_15(%arg0: i32) -> (i32, i32, i32) {
    %c0_i32 = arith.constant 0 : i32
    %c0_i32_0 = arith.constant 0 : i32
    %c0_i32_1 = arith.constant 0 : i32
    return %arg0, %c0_i32, %c0_i32_0 : i32, i32, i32
  }
}

</mosaic_0001>

<bundles_post_ra>
// kernel: _forward.1
= control target key start
LH: loop header
LB: loop body
LE: loop exit
PB: predicated region body
PF: predicated region fallthrough
CT: control target
= control target key end

     0   :  { %s3143_s0 = inlined_call_operand.vmem [shape: f32[2,5,4,5,8], index: 0, kind: input, shape index: {}]   ;;  %s3144_s1 = inlined_call_operand.vmem [shape: bf16[18,16], index: 1, kind: input, shape index: {}]   ;;  %s3145_s2 = inlined_call_operand.vmem [shape: f32[1,16], index: 2, kind: input, shape index: {}]   ;;  %s3146_s3 = inlined_call_operand.vmem [shape: bf16[144,32], index: 3, kind: input, shape index: {}]   ;;  %s3147_s4 = inlined_call_operand.vmem [shape: f32[1,32], index: 4, kind: input, shape index: {}]   ;;  %s3148_s5 = inlined_call_operand.vmem [shape: bf16[16,128], index: 5, kind: input, shape index: {}]   ;;  %s3149_s6 = inlined_call_operand.vmem [shape: f32[1,128], index: 6, kind: input, shape index: {}, may-alias: {6,8}]   ;;  %s3150_s7 = inlined_call_operand.vmem [shape: bf16[32,128], index: 7, kind: input, shape index: {}]   ;;  %s3151_s8 = inlined_call_operand.vmem [shape: f32[1,128], index: 8, kind: input, shape index: {}, may-alias: {6,8}]   ;;  %s3152_s9 = inlined_call_operand.vmem [shape: bf16[32,64], index: 9, kind: input, shape index: {}]   ;;  %s3153_s10 = inlined_call_operand.vmem [shape: f32[1,64], index: 10, kind: input, shape index: {}]   ;;  %s3154_s11 = inlined_call_operand.vmem [shape: bf16[64,128], index: 11, kind: input, shape index: {}]   ;;  %s3155_s12 = inlined_call_operand.vmem [shape: f32[1,128], index: 12, kind: input, shape index: {}]   ;;  %s3156_s13 = inlined_call_operand.vmem [shape: bf16[2,64,128], index: 13, kind: output, shape index: {0}]   ;;  %s3157_s14 = inlined_call_operand.hbm [shape: bf16[2,16,128], index: 14, kind: output, shape index: {1}]   ;;  %s3158_s15 = inlined_call_operand.hbm [shape: f32[2,1,128], index: 15, kind: output, shape index: {2}]  }
   0x1   :  { %3176 = sst [smem:[#allocation10_spill]] %s3143_s0 }
   0x2   :  { %3177 = sst [smem:[#allocation11_spill]] %s3144_s1 }
   0x3   :  { %3178 = sst [smem:[#allocation12_spill]] %s3145_s2 }
   0x4   :  { %3179 = sst [smem:[#allocation13_spill]] %s3146_s3 }
   0x5   :  { %3180 = sst [smem:[#allocation14_spill]] %s3147_s4 }
   0x6   :  { %21 = vsyncpa [#allocation4], 0 }
   0x7   :  { %23 = vsyncpa [#allocation4 + $0x1], 0 }
   0x8   :  { %24 = vsyncpa [#allocation6], 0 }
   0x9   :  { %26 = vsyncpa [#allocation6 + $0x1], 0  ;;  %s2507_s18 = smov 0   ;;  %s2509_s19 = smov 0  }
   0xa   :  { %s2511_s20 = smov 0   ;;  %s2513_s21 = smov 0  }
   0xb LB: > { %s2528_s22 = sadd.s32 4294967295, %s2406_s21   ;;  %s1988_s23 = sadd.s32 4294967294, %s2406_s21   ;;  %s2406_s21 = sphi %s2513_s21, %s3203_s21   ;;  %s2402_s20 = sphi %s2511_s20, %s3202_s20   ;;  %s2398_s19 = sphi %s2509_s19, %s3201_s19   ;;  %s2394_s18 = sphi %s2507_s18, %s3200_s18  }
   0xc   : > { %s2532_s24 = sadd.s32 1, %s2406_s21   ;;  %s343_s25 = sadd.s32 1, %s2402_s20 }
   0xd   : > { %s340_s26 = ssub.s32 %s2406_s21, %s2532_s24  ;;  %p353_p0 = scmp.ne.s32.totalorder %s2402_s20, %s2398_s19 }
   0xe   : > { %p341_p1 = scmp.eq.s32.totalorder %s340_s26, 0  ;;  %p354_p2 = scmp.eq.s32.totalorder %s2528_s22, 1 }
   0xf   : > { %p359_p3 = scmp.ne.s32.totalorder %s2398_s19, %s2394_s18  ;;  %p360_p4 = scmp.eq.s32.totalorder %s1988_s23, 1 }
  0x10   : > { %s2543_s27 = scalar_select %p341_p1, %s2402_s20, %s343_s25  }
  0x11   : > { %p2545_p5 = por %p354_p2, %p353_p0  ;;  %p2549_p6 = por %p360_p4, %p359_p3 }
  0x12   : > { %3181 = sst [smem:[#allocation9_spill]] %s2543_s27  ;;  %p1991_p7 = scmp.ge.s32.totalorder %s2406_s21, 1 }
  0x13   : > { %p448_p8 = scmp.lt.s32.totalorder %s2406_s21, 3 }
  0x15   : > { %p449_p9 = pnand %p1991_p7, %p448_p8 }
  0x16   : > { %p505_p10 = scmp.lt.s32.totalorder (!%p449_p9), %s2528_s22, 1  ;;  %s3184_s0 = sld [smem:[#allocation10_spill]] (!%p449_p9)  ;;  %vm938_vm0 = vcmask (!%p449_p9), 1040384   ;;  %vm565_vm1 = vcmask (!%p449_p9), 48128   ;;  %vm570_vm2 = vcmask (!%p449_p9), 64512   ;;  %vm575_vm3 = vcmask (!%p449_p9), 80896  }
  0x17   : > { %452 = sbr.rel (%p449_p9) target bundleno = 1746 (0x6d2), region = 72  ;;  %s3165_s26 = smov (!%p449_p9), 6   ;;  %vm580_vm4 = vcmask (!%p449_p9), 97280   ;;  %vm585_vm5 = vcmask (!%p449_p9), 113664   ;;  %vm590_vm6 = vcmask (!%p449_p9), 130048   ;;  %vm925_vm7 = vcmask (!%p449_p9), 146432  }
  0x18   : > { %s3163_s17 = smov (!%p449_p9), 4   ;;  %s3161_s23 = smov (!%p449_p9), 2   ;;  %vm683_vm8 = vcmask (!%p449_p9), 31744   ;;  %vm1199_vm9 = vcmask (!%p449_p9), 126976   ;;  %vm1221_vm10 = vcmask (!%p449_p9), 125952   ;;  %vm1224_vm11 = vcmask (!%p449_p9), 130052  }
  0x19   : > { %s3185_s1 = sld [smem:[#allocation11_spill]] (!%p449_p9)  ;;  %s2414_s27 = smov (!%p449_p9), 8   ;;  %vm1387_vm12 = vcmask (!%p449_p9), 261120   ;;  %vm1392_vm13 = vcmask (!%p449_p9), 392192   ;;  %vm1397_vm14 = vcmask (!%p449_p9), 523264   ;;  %vm1402_vm15 = vcmask (!%p449_p9), 654336  }
  0x1a   : > { %s3192_s2 = sld [smem:[#allocation12_spill]] (!%p449_p9)  ;;  %s3193_s3 = sld [smem:[#allocation13_spill]] (!%p449_p9) }
  0x1b   : > { %s3196_s4 = sld [smem:[#allocation14_spill]] (!%p449_p9) }
  0x1e   : > { %s2557_s30 = scalar_select %p505_p10, %s2528_s22, 1 }
  0x1f   : > { %v2240_v20 = vld [vmem:[%s3185_s1] sm:$0xff]   ;;  %v2241_v21 = vld [vmem:[%s3185_s1 + $0x8] ss:$0 sps:$4 sm:$0x11]  }
  0x20   : > { %s2178_s16 = smul.u32 160, %s2557_s30  ;;  %2127 = vmatprep.subr.bf16.mxu0 %v2240_v20  ;;  %v940_v22 = vsel %vm938_vm0, %v2241_v21, 0 }
  0x21   : > { %2128 = vmatpush3.bf16.msra.mxu0 %v2240_v20 }
  0x22   : > { %s2563_s25 = scalar_lea.vmem %s3184_s0, %s2178_s16  ;;  %s3159_s16 = smov 124   ;;  %2177 = vmatprep.subr.msk.bf16.mxu0 %vm938_vm0, %v2241_v21 }
  0x23   : > { %v525_v0 = vld [vmem:[%s2563_s25 + $0x48] sm:$0x1f]  ;;  %v2574_v4 = vld [vmem:[%s2563_s25 + $0x20] sm:$0x1f]  ;;  %v2612_v12 = vld [vmem:[%s2563_s25 + $0x30] sm:$0x1f] }
  0x24   : > { %v517_v1 = vld [vmem:[%s2563_s25 + $0x8] sm:$0x1f]  ;;  %541 = vrot.lane.b32.xlu1 %v525_v0, %s3165_s26  ;;  %v2577_v5 = vld [vmem:[%s2563_s25] sm:$0x1f]  ;;  %v612_v8 = vrot.slane %v2574_v4, 1  ;;  %v641_v19 = vrot.slane %v525_v0, 1 }
  0x25   : > { %537 = vrot.lane.b32.xlu0 %v517_v1, %s3165_s26  ;;  %v529_v2 = vld [vmem:[%s2563_s25 + $0x68] sm:$0x1f]  ;;  %v2580_v6 = vld [vmem:[%s2563_s25 + $0x60] sm:$0x1f]  ;;  %v611_v9 = vrot.slane %v2577_v5, 1  ;;  %v639_v17 = vrot.slane %v517_v1, 1  ;;  %2130 = vmatpush3.bf16.msra.mxu0 %v940_v22 }
  0x26   : > { %v521_v3 = vld [vmem:[%s2563_s25 + $0x28] sm:$0x1f]  ;;  %v2583_v7 = vld [vmem:[%s2563_s25 + $0x40] sm:$0x1f]  ;;  %v614_v10 = vrot.slane %v2580_v6, 1  ;;  %v642_v18 = vrot.slane %v529_v2, 1 }
  0x27   : > { %v613_v11 = vrot.slane %v2583_v7, 1  ;;  %v2615_v13 = vld [vmem:[%s2563_s25 + $0x10] sm:$0x1f]  ;;  %v640_v16 = vrot.slane %v521_v3, 1  ;;  %v668_v23 = vrot.slane %v2612_v12, 1  ;;  %s3169_s0 = smov 16  }
  0x28   : > { %543 = vrot.lane.b32.xlu1 %v529_v2, %s3165_s26  ;;  %v2622_v14 = vld [vmem:[%s2563_s25 + $0x70] sm:$0x1f]  ;;  %v667_v24 = vrot.slane %v2615_v13, 1  ;;  %v523_v27 = vld [vmem:[%s2563_s25 + $0x38] sm:$0x1f] }
  0x29   : > { %539 = vrot.lane.b32.xlu0 %v521_v3, %s3165_s26  ;;  %v2625_v15 = vld [vmem:[%s2563_s25 + $0x50] sm:$0x1f]  ;;  %v670_v25 = vrot.slane %v2622_v14, 1  ;;  %v519_v28 = vld [vmem:[%s2563_s25 + $0x18] sm:$0x1f]  ;;  %s3186_s26 = smov 6  }
  0x2a   : > { %v669_v26 = vrot.slane %v2625_v15, 1  ;;  %v531_v29 = vld [vmem:[%s2563_s25 + $0x78] sm:$0x1f]  ;;  %v532_v31 = vld [vmem:[%s2563_s25 + $0x80] sm:$0x1f]  ;;  %v802_v32 = vrot.slane %v523_v27, 1 }
  0x2b   : > { %v527_v30 = vld [vmem:[%s2563_s25 + $0x58] sm:$0x1f]  ;;  %v801_v33 = vrot.slane %v519_v28, 1  ;;  %v804_v34 = vrot.slane %v531_v29, 1  ;;  %s3191_s25 = smov 16   ;;  %v829_v40 = vrot.slane %v532_v31, 1 }
  0x2c   : > { %601 = vrot.lane.b32.xlu1 %v2574_v4, %s3159_s16  ;;  %v803_v35 = vrot.slane %v527_v30, 1 }
  0x2d   : > { %599 = vrot.lane.b32.xlu0 %v2577_v5, %s3159_s16 }
  0x30   : > { %605 = vrot.lane.b32.xlu1 %v2580_v6, %s3159_s16 }
  0x31   : > { %603 = vrot.lane.b32.xlu0 %v2583_v7, %s3159_s16  ;;  %s3167_s16 = smov 12  }
  0x34   : > { %617 = vrot.lane.b32.xlu1 %v612_v8, %s3163_s17 }
  0x35   : > { %615 = vrot.lane.b32.xlu0 %v611_v9, %s3163_s17 }
  0x38   : > { %621 = vrot.lane.b32.xlu1 %v614_v10, %s3163_s17 }
  0x39   : > { %619 = vrot.lane.b32.xlu0 %v613_v11, %s3163_s17  ;;  %s3188_s17 = smov 4  }
  0x3c   : > { %629 = vrot.lane.b32.xlu1 %v521_v3, %s3161_s23 }
  0x3d   : > { %627 = vrot.lane.b32.xlu0 %v517_v1, %s3161_s23 }
  0x40   : > { %633 = vrot.lane.b32.xlu1 %v529_v2, %s3161_s23 }
  0x41   : > { %631 = vrot.lane.b32.xlu0 %v525_v0, %s3161_s23  ;;  %s2413_s23 = smov 10  }
  0x44   : > { %555 = vrot.lane.b32.xlu1 %v2612_v12, %s3167_s16 }
  0x45   : > { %553 = vrot.lane.b32.xlu0 %v2615_v13, %s3167_s16 }
  0x48   : > { %559 = vrot.lane.b32.xlu1 %v2622_v14, %s3167_s16 }
  0x49   : > { %557 = vrot.lane.b32.xlu0 %v2625_v15, %s3167_s16  ;;  %s3187_s16 = smov 124  }
  0x4c   : > { %645 = vrot.lane.b32.xlu1 %v640_v16, %s2413_s23 }
  0x4d   : > { %643 = vrot.lane.b32.xlu0 %v639_v17, %s2413_s23 }
  0x50   : > { %649 = vrot.lane.b32.xlu1 %v642_v18, %s2413_s23 }
  0x51   : > { %647 = vrot.lane.b32.xlu0 %v641_v19, %s2413_s23 }
  0x54   : > { %657 = vrot.lane.b32.xlu1 %v2612_v12, %s2414_s27 }
  0x55   : > { %655 = vrot.lane.b32.xlu0 %v2615_v13, %s2414_s27 }
  0x58   : > { %661 = vrot.lane.b32.xlu1 %v2622_v14, %s2414_s27 }
  0x59   : > { %659 = vrot.lane.b32.xlu0 %v2625_v15, %s2414_s27 }
  0x5c   : > { %673 = vrot.lane.b32.xlu1 %v668_v23, %s3169_s0 }
  0x5d   : > { %671 = vrot.lane.b32.xlu0 %v667_v24, %s3169_s0 }
  0x60   : > { %677 = vrot.lane.b32.xlu1 %v670_v25, %s3169_s0 }
  0x61   : > { %675 = vrot.lane.b32.xlu0 %v669_v26, %s3169_s0  ;;  %s3190_s0 = smov 12  }
  0x64   : > { %718 = vrot.lane.b32.xlu1 %v523_v27, %s3186_s26 }
  0x65   : > { %716 = vrot.lane.b32.xlu0 %v519_v28, %s3186_s26 }
  0x68   : > { %722 = vrot.lane.b32.xlu1 %v531_v29, %s3186_s26 }
  0x69   : > { %720 = vrot.lane.b32.xlu0 %v527_v30, %s3186_s26  ;;  %s3189_s26 = smov 2  }
  0x6c   : > { %767 = vrot.lane.b32.xlu1 %v2612_v12, %s3187_s16 }
  0x6d   : > { %765 = vrot.lane.b32.xlu0 %v2615_v13, %s3187_s16 }
  0x70   : > { %771 = vrot.lane.b32.xlu1 %v2622_v14, %s3187_s16 }
  0x71   : > { %769 = vrot.lane.b32.xlu0 %v2625_v15, %s3187_s16  ;;  %s3174_s16 = smov 96  }
  0x74   : > { %779 = vrot.lane.b32.xlu1 %v668_v23, %s3188_s17 }
  0x75   : > { %777 = vrot.lane.b32.xlu0 %v667_v24, %s3188_s17 }
  0x78   : > { %783 = vrot.lane.b32.xlu1 %v670_v25, %s3188_s17 }
  0x79   : > { %781 = vrot.lane.b32.xlu0 %v669_v26, %s3188_s17 }
  0x7c   : > { %791 = vrot.lane.b32.xlu1 %v523_v27, %s3189_s26 }
  0x7d   : > { %789 = vrot.lane.b32.xlu0 %v519_v28, %s3189_s26 }
  0x80   : > { %795 = vrot.lane.b32.xlu1 %v531_v29, %s3189_s26 }
  0x81   : > { %793 = vrot.lane.b32.xlu0 %v527_v30, %s3189_s26  ;;  %s3194_s26 = smov 32  }
  0x84   : > { %731 = vrot.lane.b32.xlu1 %v2583_v7, %s3190_s0 }
  0x85   : > { %729 = vrot.lane.b32.xlu0 %v2574_v4, %s3190_s0 }
  0x88   : > { %735 = vrot.lane.b32.xlu1 %v532_v31, %s3190_s0 }
  0x89   : > { %733 = vrot.lane.b32.xlu0 %v2580_v6, %s3190_s0  ;;  %s3171_s0 = smov 32  }
  0x8c   : > { %807 = vrot.lane.b32.xlu1 %v802_v32, %s2413_s23 }
  0x8d   : > { %805 = vrot.lane.b32.xlu0 %v801_v33, %s2413_s23 }
  0x90   : > { %811 = vrot.lane.b32.xlu1 %v804_v34, %s2413_s23 }
  0x91   : > { %809 = vrot.lane.b32.xlu0 %v803_v35, %s2413_s23  ;;  %s3173_s23 = smov 64  }
  0x94   : > { %819 = vrot.lane.b32.xlu1 %v2583_v7, %s2414_s27 }
  0x95   : > { %817 = vrot.lane.b32.xlu0 %v2574_v4, %s2414_s27 }
  0x96   : > { %v542_v36 = vpop.permute.xlu1 %541 }
  0x97   : > { %v538_v37 = vpop.permute.xlu0 %537  ;;  %v568_v57 = vsel %vm565_vm1, %v2583_v7, %v542_v36 }
  0x98   : > { %823 = vrot.lane.b32.xlu1 %v532_v31, %s2414_s27  ;;  %v566_v51 = vsel %vm565_vm1, %v2577_v5, %v538_v37  ;;  %v573_v63 = vsel %vm570_vm2, %v568_v57, %v542_v36 }
  0x99   : > { %821 = vrot.lane.b32.xlu0 %v2580_v6, %s2414_s27  ;;  %v571_v55 = vsel %vm570_vm2, %v566_v51, %v538_v37  ;;  %v578_v5 = vsel %vm575_vm3, %v573_v63, %v542_v36  ;;  %s2418_s27 = smov 48  }
  0x9a   : > { %v544_v38 = vpop.permute.xlu1 %543  ;;  %v576_v59 = vsel %vm575_vm3, %v571_v55, %v538_v37 }
  0x9b   : > { %v540_v39 = vpop.permute.xlu0 %539  ;;  %v569_v58 = vsel %vm565_vm1, %v2580_v6, %v544_v38 }
  0x9c   : > { %832 = vrot.lane.b32.xlu1 %v613_v11, %s3191_s25  ;;  %v567_v52 = vsel %vm565_vm1, %v2574_v4, %v540_v39  ;;  %v574_v0 = vsel %vm570_vm2, %v569_v58, %v544_v38 }
  0x9d   : > { %830 = vrot.lane.b32.xlu0 %v612_v8, %s3191_s25  ;;  %v572_v56 = vsel %vm570_vm2, %v567_v52, %v540_v39  ;;  %v579_v6 = vsel %vm575_vm3, %v574_v0, %v544_v38 }
  0x9e   : > { %v602_v41 = vpop.permute.xlu1 %601  ;;  %v577_v60 = vsel %vm575_vm3, %v572_v56, %v540_v39 }
  0x9f   : > { %v600_v42 = vpop.permute.xlu0 %599 }
  0xa0   : > { %836 = vrot.lane.b32.xlu1 %v829_v40, %s3191_s25 }
  0xa1   : > { %834 = vrot.lane.b32.xlu0 %v614_v10, %s3191_s25 }
  0xa2   : > { %v606_v43 = vpop.permute.xlu1 %605 }
  0xa3   : > { %v604_v44 = vpop.permute.xlu0 %603 }
  0xa6   : > { %v618_v45 = vpop.permute.xlu1 %617 }
  0xa7   : > { %v616_v46 = vpop.permute.xlu0 %615  ;;  %v685_v30 = vsel %vm683_vm8, %v602_v41, %v618_v45 }
  0xa8   : > { %v684_v31 = vsel %vm683_vm8, %v600_v42, %v616_v46 }
  0xaa   : > { %v622_v47 = vpop.permute.xlu1 %621 }
  0xab   : > { %v620_v48 = vpop.permute.xlu0 %619  ;;  %v687_v34 = vsel %vm683_vm8, %v606_v43, %v622_v47 }
  0xac   : > { %v686_v35 = vsel %vm683_vm8, %v604_v44, %v620_v48 }
  0xae   : > { %v630_v49 = vpop.permute.xlu1 %629 }
  0xaf   : > { %v628_v50 = vpop.permute.xlu0 %627  ;;  %v689_v32 = vsel %vm565_vm1, %v685_v30, %v630_v49 }
  0xb0   : > { %v688_v33 = vsel %vm565_vm1, %v684_v31, %v628_v50  ;;  %v693_v40 = vsel %vm570_vm2, %v689_v32, %v630_v49 }
  0xb1   : > { %v692_v41 = vsel %vm570_vm2, %v688_v33, %v628_v50 }
  0xb2   : > { %v634_v53 = vpop.permute.xlu1 %633 }
  0xb3   : > { %v632_v54 = vpop.permute.xlu0 %631  ;;  %v691_v36 = vsel %vm565_vm1, %v687_v34, %v634_v53 }
  0xb4   : > { %v690_v37 = vsel %vm565_vm1, %v686_v35, %v632_v54  ;;  %v695_v46 = vsel %vm570_vm2, %v691_v36, %v634_v53 }
  0xb5   : > { %v694_v43 = vsel %vm570_vm2, %v690_v37, %v632_v54 }
  0xb6   : > { %v556_v61 = vpop.permute.xlu1 %555 }
  0xb7   : > { %v554_v62 = vpop.permute.xlu0 %553  ;;  %v582_v1 = vsel %vm580_vm4, %v577_v60, %v556_v61 }
  0xb8   : > { %v581_v2 = vsel %vm580_vm4, %v576_v59, %v554_v62  ;;  %v587_v3 = vsel %vm585_vm5, %v582_v1, %v556_v61 }
  0xb9   : > { %v586_v4 = vsel %vm585_vm5, %v581_v2, %v554_v62  ;;  %v592_v9 = vsel %vm590_vm6, %v587_v3, %v556_v61 }
  0xba   : > { %v560_v7 = vpop.permute.xlu1 %559  ;;  %v591_v10 = vsel %vm590_vm6, %v586_v4, %v554_v62 }
  0xbb   : > { %v558_v8 = vpop.permute.xlu0 %557  ;;  %v584_v11 = vsel %vm580_vm4, %v579_v6, %v560_v7  ;;  %v874_v23 = vcombine.low %v591_v10, %v592_v9 }
  0xbc   : > { %v583_v16 = vsel %vm580_vm4, %v578_v5, %v558_v8  ;;  %v589_v17 = vsel %vm585_vm5, %v584_v11, %v560_v7 }
  0xbd   : > { %v588_v18 = vsel %vm585_vm5, %v583_v16, %v558_v8  ;;  %v594_v19 = vsel %vm590_vm6, %v589_v17, %v560_v7 }
  0xbe   : > { %v593_v20 = vsel %vm590_vm6, %v588_v18, %v558_v8  ;;  %v646_v21 = vpop.permute.xlu1 %645 }
  0xbf   : > { %v644_v22 = vpop.permute.xlu0 %643  ;;  %v875_v24 = vcombine.low %v593_v20, %v594_v19  ;;  %v697_v42 = vsel %vm575_vm3, %v693_v40, %v646_v21 }
  0xc0   : > { %v696_v45 = vsel %vm575_vm3, %v692_v41, %v644_v22 }
  0xc1   : > { %v902_v25 = vpack.c.bf16 %v875_v24, %v874_v23 }
  0xc2   : > { %v650_v26 = vpop.permute.xlu1 %649 }
  0xc3   : > { %v648_v27 = vpop.permute.xlu0 %647  ;;  %2131 = vmatprep.mubr.msk.bf16.mxu0 %vm925_vm7, %v902_v25  ;;  %v699_v48 = vsel %vm575_vm3, %v695_v46, %v650_v26 }
  0xc4   : > { %v698_v51 = vsel %vm575_vm3, %v694_v43, %v648_v27 }
  0xc6   : > { %v658_v28 = vpop.permute.xlu1 %657 }
  0xc7   : > { %v656_v29 = vpop.permute.xlu0 %655  ;;  %v701_v44 = vsel %vm580_vm4, %v697_v42, %v658_v28 }
  0xc8   : > { %v700_v47 = vsel %vm580_vm4, %v696_v45, %v656_v29  ;;  %v705_v56 = vsel %vm585_vm5, %v701_v44, %v658_v28 }
  0xc9   : > { %v704_v53 = vsel %vm585_vm5, %v700_v47, %v656_v29 }
  0xca   : > { %v662_v38 = vpop.permute.xlu1 %661 }
  0xcb   : > { %v660_v39 = vpop.permute.xlu0 %659  ;;  %v703_v50 = vsel %vm580_vm4, %v699_v48, %v662_v38 }
  0xcc   : > { %v702_v55 = vsel %vm580_vm4, %v698_v51, %v660_v39  ;;  %v707_v58 = vsel %vm585_vm5, %v703_v50, %v662_v38 }
  0xcd   : > { %v706_v59 = vsel %vm585_vm5, %v702_v55, %v660_v39 }
  0xce   : > { %v674_v52 = vpop.permute.xlu1 %673 }
  0xcf   : > { %v672_v49 = vpop.permute.xlu0 %671  ;;  %v709_v54 = vsel %vm590_vm6, %v705_v56, %v674_v52 }
  0xd0   : > { %v708_v57 = vsel %vm590_vm6, %v704_v53, %v672_v49 }
  0xd1   : > { %v882_v0 = vcombine.low %v708_v57, %v709_v54 }
  0xd2   : > { %v678_v60 = vpop.permute.xlu1 %677 }
  0xd3   : > { %v676_v61 = vpop.permute.xlu0 %675  ;;  %v711_v62 = vsel %vm590_vm6, %v707_v58, %v678_v60 }
  0xd4   : > { %v710_v63 = vsel %vm590_vm6, %v706_v59, %v676_v61 }
  0xd5   : > { %v883_v1 = vcombine.low %v710_v63, %v711_v62 }
  0xd6   : > { %v719_v3 = vpop.permute.xlu1 %718 }
  0xd7   : > { %v903_v2 = vpack.c.bf16 %v883_v1, %v882_v0  ;;  %v717_v4 = vpop.permute.xlu0 %716  ;;  %v742_v21 = vsel %vm565_vm1, %v2612_v12, %v719_v3 }
  0xd8   : > { %v741_v22 = vsel %vm565_vm1, %v2615_v13, %v717_v4  ;;  %v746_v25 = vsel %vm570_vm2, %v742_v21, %v719_v3 }
  0xd9   : > { %2132 = vmatmul.mubr.msk.bf16.vlgmr.msra.gmra.mrb[0].mxu0 %vm925_vm7, %v903_v2  ;;  %v745_v26 = vsel %vm570_vm2, %v741_v22, %v717_v4  ;;  %v750_v29 = vsel %vm575_vm3, %v746_v25, %v719_v3 }
  0xda   : > { %v723_v5 = vpop.permute.xlu1 %722  ;;  %v749_v30 = vsel %vm575_vm3, %v745_v26, %v717_v4 }
  0xdb   : > { %v721_v6 = vpop.permute.xlu0 %720  ;;  %v744_v27 = vsel %vm565_vm1, %v2622_v14, %v723_v5 }
  0xdc   : > { %v743_v28 = vsel %vm565_vm1, %v2625_v15, %v721_v6  ;;  %v748_v13 = vsel %vm570_vm2, %v744_v27, %v723_v5 }
  0xdd   : > { %v747_v32 = vsel %vm570_vm2, %v743_v28, %v721_v6  ;;  %v752_v15 = vsel %vm575_vm3, %v748_v13, %v723_v5  ;;  %v2416_v13 = vmov 0.0  }
  0xde   : > { %v768_v7 = vpop.permute.xlu1 %767  ;;  %v751_v36 = vsel %vm575_vm3, %v747_v32, %v721_v6  ;;  %1210 = vst.msk [vmem:[#allocation2 + $0x50] sm:$0x1f] %vm1199_vm9, %v2416_v13  ;;  %1211 = vst.msk [vmem:[#allocation2 + $0x58] sm:$0x1f] %vm1199_vm9, %v2416_v13  ;;  %2149 = vmatprep.subr.bf16.mxu0 %v2416_v13 }
  0xdf   : > { %v766_v8 = vpop.permute.xlu0 %765  ;;  %1200 = vst.msk [vmem:[#allocation2] sm:$0x1f] %vm1199_vm9, %v2416_v13  ;;  %1201 = vst.msk [vmem:[#allocation2 + $0x8] sm:$0x1f] %vm1199_vm9, %v2416_v13 }
  0xe0   : > { %1202 = vst.msk [vmem:[#allocation2 + $0x10] sm:$0x1f] %vm1199_vm9, %v2416_v13  ;;  %1203 = vst.msk [vmem:[#allocation2 + $0x18] sm:$0x1f] %vm1199_vm9, %v2416_v13 }
  0xe1   : > { %1204 = vst.msk [vmem:[#allocation2 + $0x20] sm:$0x1f] %vm1199_vm9, %v2416_v13  ;;  %1205 = vst.msk [vmem:[#allocation2 + $0x28] sm:$0x1f] %vm1199_vm9, %v2416_v13 }
  0xe2   : > { %v772_v9 = vpop.permute.xlu1 %771  ;;  %1206 = vst.msk [vmem:[#allocation2 + $0x30] sm:$0x1f] %vm1199_vm9, %v2416_v13  ;;  %1207 = vst.msk [vmem:[#allocation2 + $0x38] sm:$0x1f] %vm1199_vm9, %v2416_v13 }
  0xe3   : > { %v770_v10 = vpop.permute.xlu0 %769  ;;  %1208 = vst.msk [vmem:[#allocation2 + $0x40] sm:$0x1f] %vm1199_vm9, %v2416_v13  ;;  %1209 = vst.msk [vmem:[#allocation2 + $0x48] sm:$0x1f] %vm1199_vm9, %v2416_v13 }
  0xe4   : > { %1212 = vst.msk [vmem:[#allocation2 + $0x60] sm:$0x1f] %vm1199_vm9, %v2416_v13  ;;  %1213 = vst.msk [vmem:[#allocation2 + $0x68] sm:$0x1f] %vm1199_vm9, %v2416_v13 }
  0xe5   : > { %1215 = vst.msk [vmem:[#allocation2 + $0x78] sm:$0x1f] %vm1199_vm9, %v2416_v13  ;;  %1216 = vst.msk [vmem:[#allocation2 + $0x80] sm:$0x1f] %vm1199_vm9, %v2416_v13 }
  0xe6   : > { %v780_v11 = vpop.permute.xlu1 %779  ;;  %1217 = vst.msk [vmem:[#allocation2 + $0x88] sm:$0x1f] %vm1199_vm9, %v2416_v13  ;;  %1218 = vst.msk [vmem:[#allocation2 + $0x90] sm:$0x1f] %vm1199_vm9, %v2416_v13 }
  0xe7   : > { %v778_v16 = vpop.permute.xlu0 %777  ;;  %v843_v54 = vsel %vm683_vm8, %v768_v7, %v780_v11 }
  0xe8   : > { %v842_v57 = vsel %vm683_vm8, %v766_v8, %v778_v16  ;;  %v1259_v32 = vld [vmem:[#allocation2 + $0x28] sm:$0x1f] }
  0xe9   : > { %1276 = vrot.lane.b32.xlu0 %v1259_v32, %s3191_s25 }
  0xea   : > { %v784_v17 = vpop.permute.xlu1 %783 }
  0xeb   : > { %v782_v18 = vpop.permute.xlu0 %781  ;;  %v845_v60 = vsel %vm683_vm8, %v772_v9, %v784_v17 }
  0xec   : > { %v844_v61 = vsel %vm683_vm8, %v770_v10, %v782_v18 }
  0xee   : > { %v792_v19 = vpop.permute.xlu1 %791 }
  0xef   : > { %v790_v20 = vpop.permute.xlu0 %789  ;;  %v847_v58 = vsel %vm565_vm1, %v843_v54, %v792_v19 }
  0xf0   : > { %v846_v59 = vsel %vm565_vm1, %v842_v57, %v790_v20  ;;  %v851_v2 = vsel %vm570_vm2, %v847_v58, %v792_v19 }
  0xf1   : > { %v850_v3 = vsel %vm570_vm2, %v846_v59, %v790_v20 }
  0xf2   : > { %v796_v23 = vpop.permute.xlu1 %795 }
  0xf3   : > { %v794_v24 = vpop.permute.xlu0 %793  ;;  %v849_v62 = vsel %vm565_vm1, %v845_v60, %v796_v23 }
  0xf4   : > { %v848_v63 = vsel %vm565_vm1, %v844_v61, %v794_v24  ;;  %v853_v6 = vsel %vm570_vm2, %v849_v62, %v796_v23  ;;  %vm1407_vm1 = vcmask 785408  }
  0xf5   : > { %v852_v7 = vsel %vm570_vm2, %v848_v63, %v794_v24  ;;  %vm1412_vm2 = vcmask 916480  }
  0xf6   : > { %v732_v12 = vpop.permute.xlu1 %731 }
  0xf7   : > { %v730_v31 = vpop.permute.xlu0 %729  ;;  %v754_v33 = vsel %vm580_vm4, %v750_v29, %v732_v12 }
  0xf8   : > { %v753_v34 = vsel %vm580_vm4, %v749_v30, %v730_v31  ;;  %v758_v35 = vsel %vm585_vm5, %v754_v33, %v732_v12  ;;  %v2242_v33 = vld [vmem:[%s3148_s5] sm:$0xff]  }
  0xf9   : > { %v757_v14 = vsel %vm585_vm5, %v753_v34, %v730_v31  ;;  %v762_v39 = vsel %vm590_vm6, %v758_v35, %v732_v12  ;;  %v2869_v34 = vld [vmem:[#allocation2] sm:$0x1f]  ;;  %2139 = vmatprep.subr.bf16.mxu1 %v2242_v33 }
  0xfa   : > { %v736_v37 = vpop.permute.xlu1 %735  ;;  %v761_v40 = vsel %vm590_vm6, %v757_v14, %v730_v31  ;;  %v1292_v35 = vrot.slane %v2869_v34, 1  ;;  %2140 = vmatpush3.bf16.msra.mxu1 %v2242_v33  ;;  %v2876_v14 = vld [vmem:[%s3192_s2] ss:$0 sm:$0xff] }
  0xfb   : > { %v734_v38 = vpop.permute.xlu0 %733  ;;  %v756_v41 = vsel %vm580_vm4, %v752_v15, %v736_v37  ;;  %v890_v47 = vcombine.low %v761_v40, %v762_v39 }
  0xfc   : > { %v755_v42 = vsel %vm580_vm4, %v751_v36, %v734_v38  ;;  %v760_v45 = vsel %vm585_vm5, %v756_v41, %v736_v37  ;;  %1296 = vrot.lane.b32.xlu0 %v1292_v35, %s3171_s0  ;;  %s2421_s0 = smov 80  }
  0xfd   : > { %v759_v46 = vsel %vm585_vm5, %v755_v42, %v734_v38  ;;  %v764_v43 = vsel %vm590_vm6, %v760_v45, %v736_v37 }
  0xfe   : > { %v763_v44 = vsel %vm590_vm6, %v759_v46, %v734_v38  ;;  %v808_v51 = vpop.permute.xlu1 %807 }
  0xff   : > { %v891_v48 = vcombine.low %v763_v44, %v764_v43  ;;  %v806_v52 = vpop.permute.xlu0 %805  ;;  %v855_v4 = vsel %vm575_vm3, %v851_v2, %v808_v51 }
 0x100   : > { %v854_v5 = vsel %vm575_vm3, %v850_v3, %v806_v52 }
 0x101   : > { %v904_v49 = vpack.c.bf16 %v891_v48, %v890_v47 }
 0x102   : > { %v812_v50 = vpop.permute.xlu1 %811 }
 0x103   : > { %v810_v55 = vpop.permute.xlu0 %809  ;;  %2135 = vmatprep.mubr.msk.bf16.mxu0 %vm925_vm7, %v904_v49  ;;  %v857_v10 = vsel %vm575_vm3, %v853_v6, %v812_v50 }
 0x104   : > { %v856_v11 = vsel %vm575_vm3, %v852_v7, %v810_v55  ;;  %vm2424_vm3 = vmmov 0  }
 0x106   : > { %v820_v56 = vpop.permute.xlu1 %819 }
 0x107   : > { %v818_v53 = vpop.permute.xlu0 %817  ;;  %v859_v8 = vsel %vm580_vm4, %v855_v4, %v820_v56 }
 0x108   : > { %v858_v9 = vsel %vm580_vm4, %v854_v5, %v818_v53  ;;  %v863_v20 = vsel %vm585_vm5, %v859_v8, %v820_v56  ;;  %v2243_v5 = vld [vmem:[%s3193_s3] sm:$0xff]   ;;  %v2420_v8 = vmov 0  }
 0x109   : > { %v862_v21 = vsel %vm585_vm5, %v858_v9, %v818_v53  ;;  %1517 = vmatprep.subr.bf16.mxu1 %v2420_v8 }
 0x10a   : > { %v824_v0 = vpop.permute.xlu1 %823 }
 0x10b   : > { %v822_v1 = vpop.permute.xlu0 %821  ;;  %v861_v18 = vsel %vm580_vm4, %v857_v10, %v824_v0 }
 0x10c   : > { %v860_v19 = vsel %vm580_vm4, %v856_v11, %v822_v1  ;;  %v865_v24 = vsel %vm585_vm5, %v861_v18, %v824_v0 }
 0x10d   : > { %v864_v25 = vsel %vm585_vm5, %v860_v19, %v822_v1 }
 0x10e   : > { %v833_v16 = vpop.permute.xlu1 %832 }
 0x10f   : > { %v831_v17 = vpop.permute.xlu0 %830  ;;  %v867_v22 = vsel %vm590_vm6, %v863_v20, %v833_v16 }
 0x110   : > { %v866_v23 = vsel %vm590_vm6, %v862_v21, %v831_v17 }
 0x111   : > { %v898_v30 = vcombine.low %v866_v23, %v867_v22 }
 0x112   : > { %v837_v26 = vpop.permute.xlu1 %836 }
 0x113   : > { %v835_v27 = vpop.permute.xlu0 %834  ;;  %v869_v28 = vsel %vm590_vm6, %v865_v24, %v837_v26 }
 0x114   : > { %v868_v29 = vsel %vm590_vm6, %v864_v25, %v835_v27 }
 0x115   : > { %v899_v12 = vcombine.low %v868_v29, %v869_v28 }
 0x117   : > { %v905_v31 = vpack.c.bf16 %v899_v12, %v898_v30 }
 0x119   : > { %2136 = vmatmul.mubr.msk.bf16.gmra.mrb[4].mxu0 %vm925_vm7, %v905_v31 }
 0x11a   : > { %2153 = vmatprep.mubr.msk.bf16.mxu0 %vm2424_vm3, %v2416_v13 }
 0x1ac   : > { %v2133_v15 = vpop.f32.mrb[0].mxu0 }
 0x1ad   : > { %v985_v36 = vadd.f32 %v2133_v15, %v2876_v14  ;;  %v976_v37 = vpop.f32.mrb[1].mxu0 }
 0x1ae   : > { %v977_v38 = vadd.f32 %v2876_v14, %v976_v37  ;;  %v2134_v39 = vpop.f32.mrb[2].mxu0 }
 0x1af   : > { %v2005_v40 = vmul.f32 -1.442695, %v985_v36  ;;  %v988_v41 = vadd.f32 %v2134_v39, %v2876_v14  ;;  %v979_v42 = vpop.f32.mrb[3].mxu0 }
 0x1b0   : > { %v2003_v45 = vmul.f32 -1.442695, %v977_v38  ;;  %v980_v46 = vadd.f32 %v2876_v14, %v979_v42 }
 0x1b1   : > { %2260 = vpow2.f32 %v2005_v40  ;;  %v2006_v43 = vmul.f32 -1.442695, %v988_v41 }
 0x1b2   : > { %2262 = vpow2.f32 %v2003_v45  ;;  %v2004_v44 = vmul.f32 -1.442695, %v980_v46  ;;  %v2245_v45 = vld [vmem:[%s3193_s3 + $0x10] sm:$0xff]  }
 0x1b3   : > { %2264 = vpow2.f32 %v2006_v43 }
 0x1b4   : > { %2266 = vpow2.f32 %v2004_v44 }
 0x1bb   : > { %v2261_v47 = vpop.eup %2260 }
 0x1bc   : > { %v2263_v48 = vpop.eup %2262  ;;  %v1033_v51 = vadd.f32 1.0, %v2261_v47 }
 0x1bd   : > { %v2265_v52 = vpop.eup %2264  ;;  %v1031_v49 = vadd.f32 1.0, %v2263_v48 }
 0x1be   : > { %v2267_v50 = vpop.eup %2266  ;;  %2268 = vrcp.f32 %v1033_v51  ;;  %v1034_v55 = vadd.f32 1.0, %v2265_v52  ;;  %v2246_v51 = vld [vmem:[%s3193_s3 + $0x18] sm:$0xff]  }
 0x1bf   : > { %2270 = vrcp.f32 %v1031_v49  ;;  %v1032_v56 = vadd.f32 1.0, %v2267_v50 }
 0x1c0   : > { %2272 = vrcp.f32 %v1034_v55 }
 0x1c1   : > { %2274 = vrcp.f32 %v1032_v56 }
 0x1c8   : > { %v2269_v53 = vpop.eup %2268 }
 0x1c9   : > { %v2271_v54 = vpop.eup %2270  ;;  %v1057_v57 = vmul.f32 %v2269_v53, %v985_v36 }
 0x1ca   : > { %v2273_v58 = vpop.eup %2272  ;;  %v1055_v59 = vmul.f32 %v2271_v54, %v977_v38  ;;  %v2247_v54 = vld [vmem:[%s3193_s3 + $0x20] sm:$0xff]  }
 0x1cb   : > { %v2275_v60 = vpop.eup %2274  ;;  %1231 = vst.msk [vmem:[#allocation2 + $0x51] sm:$0xf] %vm1221_vm10, %v1057_v57  ;;  %v1058_v61 = vmul.f32 %v2273_v58, %v988_v41 }
 0x1cc   : > { %1233 = vst.msk [vmem:[#allocation2 + $0x55] sm:$0xf0] %vm1224_vm11, %v1057_v57  ;;  %1225 = vst.msk [vmem:[#allocation2 + $0x7c] sm:$0xf0] %vm1224_vm11, %v1055_v59  ;;  %v1056_v62 = vmul.f32 %v2275_v60, %v980_v46 }
 0x1cd   : > { %1222 = vst.msk [vmem:[#allocation2 + $0x78] sm:$0xf] %vm1221_vm10, %v1055_v59  ;;  %v1064_v63 = vpack.c.bf16 %v1058_v61, %v1057_v57  ;;  %1235 = vst.msk [vmem:[#allocation2 + $0x61] sm:$0xf] %vm1221_vm10, %v1058_v61 }
 0x1ce   : > { %1237 = vst.msk [vmem:[#allocation2 + $0x65] sm:$0xf0] %vm1224_vm11, %v1058_v61  ;;  %1229 = vst.msk [vmem:[#allocation2 + $0x8c] sm:$0xf0] %vm1224_vm11, %v1056_v62  ;;  %v1063_v0 = vpack.c.bf16 %v1056_v62, %v1055_v59  ;;  %v2248_v61 = vld [vmem:[%s3193_s3 + $0x28] sm:$0xff]  }
 0x1cf   : > { %1227 = vst.msk [vmem:[#allocation2 + $0x88] sm:$0xf] %vm1221_vm10, %v1056_v62 }
 0x1d0   : > { %2141 = vmatprep.mubr.msk.bf16.mxu1 %vm590_vm6, %v1063_v0 }
 0x1d1   : > { %2142 = vmatmul.mubr.msk.bf16.vlgmr.msra.gmra.mrb[0].mxu1 %vm590_vm6, %v1064_v63 }
 0x1d2   : > { %v1264_v2 = vld [vmem:[#allocation2 + $0x50] sm:$0x1f]  ;;  %1518 = vmatpush1.bf16.msra.mxu1 %v2243_v5 }
 0x1d3   : > { %v1265_v1 = vld [vmem:[#allocation2 + $0x58] sm:$0x1f]  ;;  %1312 = vrot.lane.b32.xlu0 %v1264_v2, %s2418_s27  ;;  %v1269_v3 = vld [vmem:[#allocation2 + $0x80] sm:$0x1f]  ;;  %v1340_v10 = vrot.slane %v1264_v2, 1  ;;  %1519 = vmatprep.subr.bf16.mxu1 %v2420_v8 }
 0x1d4   : > { %1314 = vrot.lane.b32.xlu1 %v1265_v1, %s2418_s27  ;;  %v1268_v4 = vld [vmem:[#allocation2 + $0x78] sm:$0x1f]  ;;  %v1266_v7 = vld [vmem:[#allocation2 + $0x60] sm:$0x1f]  ;;  %v1341_v9 = vrot.slane %v1265_v1, 1  ;;  %v2249_v1 = vld [vmem:[%s3193_s3 + $0x30] sm:$0xff]  }
 0x1d5   : > { %v1267_v6 = vld [vmem:[#allocation2 + $0x68] sm:$0x1f]  ;;  %v1271_v11 = vld [vmem:[#allocation2 + $0x90] sm:$0x1f]  ;;  %v1342_v18 = vrot.slane %v1266_v7, 1  ;;  %v2250_v2 = vld [vmem:[%s3193_s3 + $0x38] sm:$0xff]  }
 0x1d6   : > { %v1270_v16 = vld [vmem:[#allocation2 + $0x88] sm:$0x1f]  ;;  %v1343_v17 = vrot.slane %v1267_v6, 1 }
 0x1d7   : > { %1328 = vrot.lane.b32.xlu0 %v1268_v4, %s3173_s23  ;;  %v2251_v4 = vld [vmem:[%s3193_s3 + $0x40] sm:$0xff]  }
 0x1d8   : > { %1330 = vrot.lane.b32.xlu1 %v1269_v3, %s3173_s23 }
 0x1db   : > { %1316 = vrot.lane.b32.xlu0 %v1266_v7, %s2418_s27 }
 0x1dc   : > { %1318 = vrot.lane.b32.xlu1 %v1267_v6, %s2418_s27  ;;  %v1277_v6 = vpop.permute.xlu0 %1276 }
 0x1df   : > { %1344 = vrot.lane.b32.xlu0 %v1340_v10, %s2421_s0 }
 0x1e0   : > { %1346 = vrot.lane.b32.xlu1 %v1341_v9, %s2421_s0  ;;  %v1297_v7 = vpop.permute.xlu0 %1296 }
 0x1e3   : > { %1332 = vrot.lane.b32.xlu0 %v1270_v16, %s3173_s23 }
 0x1e4   : > { %1334 = vrot.lane.b32.xlu1 %v1271_v11, %s3173_s23  ;;  %s3195_s23 = smov 96  }
 0x1e7   : > { %1348 = vrot.lane.b32.xlu0 %v1342_v18, %s2421_s0 }
 0x1e8   : > { %1350 = vrot.lane.b32.xlu1 %v1343_v17, %s2421_s0  ;;  %s2423_s0 = smov 112  }
 0x1ec   : > { %v2137_v19 = vpop.f32.mrb[4].mxu0 }
 0x1ed   : > { %v1001_v20 = vadd.f32 %v2137_v19, %v2876_v14  ;;  %v992_v21 = vpop.f32.mrb[5].mxu0 }
 0x1ee   : > { %v993_v22 = vadd.f32 %v2876_v14, %v992_v21  ;;  %v2138_v23 = vpop.f32.mrb[6].mxu0 }
 0x1ef   : > { %v2009_v24 = vmul.f32 -1.442695, %v1001_v20  ;;  %v1004_v25 = vadd.f32 %v2138_v23, %v2876_v14  ;;  %v995_v26 = vpop.f32.mrb[7].mxu0 }
 0x1f0   : > { %v2007_v27 = vmul.f32 -1.442695, %v993_v22  ;;  %v996_v28 = vadd.f32 %v2876_v14, %v995_v26  ;;  %v2244_v14 = vld [vmem:[%s3193_s3 + $0x8] sm:$0xff]   ;;  %s2425_s3 = smov [#allocation3]  }
 0x1f1   : > { %2276 = vpow2.f32 %v2009_v24  ;;  %v2010_v29 = vmul.f32 -1.442695, %v1004_v25  ;;  %1520 = vmatpush1.bf16.msra.mxu1 %v2244_v14 }
 0x1f2   : > { %2278 = vpow2.f32 %v2007_v27  ;;  %v2008_v30 = vmul.f32 -1.442695, %v996_v28  ;;  %1521 = vmatprep.subr.bf16.mxu1 %v2420_v8 }
 0x1f3   : > { %2280 = vpow2.f32 %v2010_v29 }
 0x1f4   : > { %2282 = vpow2.f32 %v2008_v30 }
 0x1f5   : > { %1522 = vmatpush1.bf16.msra.mxu1 %v2245_v45 }
 0x1f6   : > { %1523 = vmatprep.subr.bf16.mxu1 %v2420_v8 }
 0x1f9   : > { %1524 = vmatpush1.bf16.msra.mxu1 %v2246_v51 }
 0x1fa   : > { %1525 = vmatprep.subr.bf16.mxu1 %v2420_v8 }
 0x1fb   : > { %v2277_v12 = vpop.eup %2276 }
 0x1fc   : > { %v2279_v31 = vpop.eup %2278  ;;  %v1037_v32 = vadd.f32 1.0, %v2277_v12 }
 0x1fd   : > { %v2281_v33 = vpop.eup %2280  ;;  %v1035_v35 = vadd.f32 1.0, %v2279_v31  ;;  %1526 = vmatpush1.bf16.msra.mxu1 %v2247_v54 }
 0x1fe   : > { %v2283_v15 = vpop.eup %2282  ;;  %2284 = vrcp.f32 %v1037_v32  ;;  %v1038_v36 = vadd.f32 1.0, %v2281_v33  ;;  %1527 = vmatprep.subr.bf16.mxu1 %v2420_v8 }
 0x1ff   : > { %2286 = vrcp.f32 %v1035_v35  ;;  %v1036_v37 = vadd.f32 1.0, %v2283_v15 }
 0x200   : > { %2288 = vrcp.f32 %v1038_v36 }
 0x201   : > { %2290 = vrcp.f32 %v1036_v37  ;;  %1528 = vmatpush1.bf16.msra.mxu1 %v2248_v61  ;;  %v1383_v37 = vsel %vm590_vm6, %v2869_v34, %v1277_v6 }
 0x202   : > { %1529 = vmatprep.subr.bf16.mxu1 %v2420_v8  ;;  %v1388_v45 = vsel %vm1387_vm12, %v1383_v37, %v1297_v7 }
 0x205   : > { %1530 = vmatpush1.bf16.msra.mxu1 %v2249_v1 }
 0x206   : > { %1531 = vmatprep.subr.bf16.mxu1 %v2420_v8 }
 0x208   : > { %v2285_v38 = vpop.eup %2284 }
 0x209   : > { %v2287_v39 = vpop.eup %2286  ;;  %v1061_v40 = vmul.f32 %v2285_v38, %v1001_v20  ;;  %1532 = vmatpush1.bf16.msra.mxu1 %v2250_v2  ;;  %v2011_v2 = vld [vmem:[%s3149_s6] ss:$0 sm:$0xff] }
 0x20a   : > { %v2289_v41 = vpop.eup %2288  ;;  %v1059_v42 = vmul.f32 %v2287_v39, %v993_v22  ;;  %1533 = vmatprep.subr.bf16.mxu1 %v2420_v8 }
 0x20b   : > { %v2291_v46 = vpop.eup %2290  ;;  %1247 = vst.msk [vmem:[#allocation2 + $0x9] sm:$0xf] %vm1221_vm10, %v1061_v40  ;;  %v1062_v43 = vmul.f32 %v2289_v41, %v1004_v25 }
 0x20c   : > { %1249 = vst.msk [vmem:[#allocation2 + $0xd] sm:$0xf0] %vm1224_vm11, %v1061_v40  ;;  %1241 = vst.msk [vmem:[#allocation2 + $0x34] sm:$0xf0] %vm1224_vm11, %v1059_v42  ;;  %v1060_v44 = vmul.f32 %v2291_v46, %v996_v28 }
 0x20d   : > { %1239 = vst.msk [vmem:[#allocation2 + $0x30] sm:$0xf] %vm1221_vm10, %v1059_v42  ;;  %v1066_v47 = vpack.c.bf16 %v1062_v43, %v1061_v40  ;;  %1251 = vst.msk [vmem:[#allocation2 + $0x19] sm:$0xf] %vm1221_vm10, %v1062_v43  ;;  %1534 = vmatpush1.bf16.msra.mxu1 %v2251_v4 }
 0x20e   : > { %1253 = vst.msk [vmem:[#allocation2 + $0x1d] sm:$0xf0] %vm1224_vm11, %v1062_v43  ;;  %v1065_v48 = vpack.c.bf16 %v1060_v44, %v1059_v42  ;;  %1245 = vst.msk [vmem:[#allocation2 + $0x44] sm:$0xf0] %vm1224_vm11, %v1060_v44 }
 0x20f   : > { %1243 = vst.msk [vmem:[#allocation2 + $0x40] sm:$0xf] %vm1221_vm10, %v1060_v44 }
 0x210   : > { %2145 = vmatprep.mubr.msk.bf16.mxu1 %vm590_vm6, %v1065_v48 }
 0x211   : > { %2146 = vmatmul.mubr.msk.bf16.gmra.mrb[4].mxu1 %vm590_vm6, %v1066_v47 }
 0x212   : > { %v2928_v49 = vld [vmem:[#allocation2 + $0x8] sm:$0x1f] }
 0x213   : > { %v2926_v52 = vld [vmem:[#allocation2 + $0x10] sm:$0x1f]  ;;  %1357 = vrot.lane.b32.xlu0 %v2928_v49, %s3174_s16  ;;  %v1293_v55 = vrot.slane %v2928_v49, 1  ;;  %v1261_v60 = vld [vmem:[#allocation2 + $0x38] sm:$0x1f] }
 0x214   : > { %v1294_v50 = vrot.slane %v2926_v52, 1  ;;  %1359 = vrot.lane.b32.xlu1 %v2926_v52, %s3174_s16  ;;  %v2936_v56 = vld [vmem:[#allocation2 + $0x18] sm:$0x1f]  ;;  %v1260_v59 = vld [vmem:[#allocation2 + $0x30] sm:$0x1f]  ;;  %s2076_s16 = sshll.u32 %s2528_s22, 7 }
 0x215   : > { %v1258_v53 = vld [vmem:[#allocation2 + $0x20] sm:$0x1f]  ;;  %v1295_v57 = vrot.slane %v2936_v56, 1  ;;  %v1263_v5 = vld [vmem:[#allocation2 + $0x48] sm:$0x1f] }
 0x216   : > { %v1382_v58 = vrot.slane %v1258_v53, 1  ;;  %v2026_v62 = vcombine.low %v1293_v55, %v1294_v50  ;;  %v1262_v3 = vld [vmem:[#allocation2 + $0x40] sm:$0x1f] }
 0x217   : > { %1280 = vrot.lane.b32.xlu0 %v1261_v60, %s3191_s25 }
 0x218   : > { %1278 = vrot.lane.b32.xlu1 %v1260_v59, %s3191_s25  ;;  %v2028_v63 = vcombine.low %v1295_v57, %v1382_v58 }
 0x21a   : > { %v1434_v0 = vpack.c.bf16 %v2028_v63, %v2026_v62 }
 0x21b   : > { %1370 = vrot.lane.b32.xlu0 %v1260_v59, %s2423_s0 }
 0x21c   : > { %1298 = vrot.lane.b32.xlu1 %v1293_v55, %s3194_s26  ;;  %2039 = vmatprep.mubr.msk.bf16.mxu1 %vm590_vm6, %v1434_v0 }
 0x21f   : > { %1300 = vrot.lane.b32.xlu0 %v1294_v50, %s3194_s26 }
 0x220   : > { %1363 = vrot.lane.b32.xlu1 %v1258_v53, %s3195_s23 }
 0x223   : > { %1361 = vrot.lane.b32.xlu0 %v2936_v56, %s3195_s23 }
 0x224   : > { %1282 = vrot.lane.b32.xlu1 %v1262_v3, %s3191_s25 }
 0x227   : > { %1374 = vrot.lane.b32.xlu0 %v1262_v3, %s2423_s0 }
 0x228   : > { %1302 = vrot.lane.b32.xlu1 %v1295_v57, %s3194_s26  ;;  %s2065_s26 = sshll.u32 %s2557_s30, 5  ;;  %s3039_s30 = sand.u32 1, %s2398_s19  }
 0x229   : > { %s514_s27 = scalar_lea.vmem %s3156_s13, %s2065_s26  ;;  %s1992_s2 = sshll.u32 %s3039_s30, 3 }
 0x22a   : > { %s3066_s26 = scalar_lea.hbm %s3157_s14, %s2076_s16 }
 0x22c   : > { %1372 = vrot.lane.b32.xlu1 %v1261_v60, %s2423_s0 }
 0x230   : > { %1376 = vrot.lane.b32.xlu1 %v1263_v5, %s2423_s0  ;;  %s3048_s0 = scalar_lea.vmem [#allocation3], %s1992_s2 }
 0x231   : > { %s1860_s1 = sshll.u32 %s3048_s0, 4  ;;  %s3060_s1 = int_to_ptr.vmem [resolvable:$true] %s1860_s1 }
 0x245   : > { %v1313_v10 = vpop.permute.xlu0 %1312 }
 0x246   : > { %v1315_v9 = vpop.permute.xlu1 %1314  ;;  %v1393_v48 = vsel %vm1392_vm13, %v1388_v45, %v1313_v10 }
 0x249   : > { %v1329_v16 = vpop.permute.xlu0 %1328 }
 0x24a   : > { %v1331_v11 = vpop.permute.xlu1 %1330 }
 0x24d   : > { %v1317_v18 = vpop.permute.xlu0 %1316 }
 0x24e   : > { %v1319_v17 = vpop.permute.xlu1 %1318 }
 0x251   : > { %v1345_v20 = vpop.permute.xlu0 %1344 }
 0x252   : > { %v1347_v19 = vpop.permute.xlu1 %1346 }
 0x255   : > { %v1333_v22 = vpop.permute.xlu0 %1332 }
 0x256   : > { %v1335_v21 = vpop.permute.xlu1 %1334 }
 0x259   : > { %v1349_v23 = vpop.permute.xlu0 %1348 }
 0x25a   : > { %v1351_v8 = vpop.permute.xlu1 %1350 }
 0x285   : > { %v1358_v25 = vpop.permute.xlu0 %1357 }
 0x286   : > { %v1360_v24 = vpop.permute.xlu1 %1359 }
 0x289   : > { %v1281_v27 = vpop.permute.xlu0 %1280 }
 0x28a   : > { %v1279_v26 = vpop.permute.xlu1 %1278  ;;  %v1385_v33 = vsel %vm590_vm6, %v2926_v52, %v1281_v27  ;;  %v2252_v27 = vld [vmem:[%s3150_s7] sm:$0xff]  }
 0x28b   : > { %v1384_v12 = vsel %vm590_vm6, %v2928_v49, %v1279_v26  ;;  %v1398_v49 = vsel %vm1397_vm14, %v1393_v48, %v1329_v16  ;;  %2150 = vmatpush3.bf16.msra.mxu0 %v2252_v27  ;;  %v2258_v48 = vld [vmem:[%s3154_s11 + $0x10] sm:$0xff]   ;;  %v1747_v27 = vld [vmem:[%s3155_s12] sm:$0x1] }
 0x28c   : > { %2151 = vmatprep.subr.bf16.mxu0 %v2416_v13 }
 0x28d   : > { %v1371_v29 = vpop.permute.xlu0 %1370 }
 0x28e   : > { %v1299_v28 = vpop.permute.xlu1 %1298 }
 0x28f   : > { %v1389_v32 = vsel %vm1387_vm12, %v1384_v12, %v1299_v28  ;;  %v2253_v28 = vld [vmem:[%s3150_s7 + $0x8] sm:$0xff]  }
 0x290   : > { %v1394_v36 = vsel %vm1392_vm13, %v1389_v32, %v1315_v9  ;;  %2152 = vmatpush3.bf16.msra.mxu0 %v2253_v28 }
 0x291   : > { %v1301_v31 = vpop.permute.xlu0 %1300  ;;  %v1399_v38 = vsel %vm1397_vm14, %v1394_v36, %v1331_v11  ;;  %2157 = vmatprep.subr.bf16.mxu0 %v2416_v13 }
 0x292   : > { %v1364_v30 = vpop.permute.xlu1 %1363  ;;  %v1390_v35 = vsel %vm1387_vm12, %v1385_v33, %v1301_v31  ;;  %v1404_v44 = vsel %vm1402_vm15, %v1399_v38, %v1347_v19 }
 0x293   : > { %v1395_v14 = vsel %vm1392_vm13, %v1390_v35, %v1317_v18  ;;  %v1409_v55 = vsel %vm1407_vm1, %v1404_v44, %v1360_v24  ;;  %v2256_v44 = vld [vmem:[%s3154_s11] sm:$0xff]  }
 0x294   : > { %v1400_v46 = vsel %vm1397_vm14, %v1395_v14, %v1333_v22 }
 0x295   : > { %v1362_v40 = vpop.permute.xlu0 %1361  ;;  %v1405_v51 = vsel %vm1402_vm15, %v1400_v46, %v1349_v23  ;;  %v2254_v46 = vld [vmem:[%s3152_s9] sm:$0xff]  }
 0x296   : > { %v1283_v15 = vpop.permute.xlu1 %1282  ;;  %v1410_v57 = vsel %vm1407_vm1, %v1405_v51, %v1362_v40  ;;  %v2259_v51 = vld [vmem:[%s3154_s11 + $0x18] sm:$0xff]  }
 0x297   : > { %v1386_v39 = vsel %vm590_vm6, %v2936_v56, %v1283_v15  ;;  %v1403_v56 = vsel %vm1402_vm15, %v1398_v49, %v1345_v20 }
 0x298   : > { %v1408_v54 = vsel %vm1407_vm1, %v1403_v56, %v1358_v25 }
 0x299   : > { %v1375_v50 = vpop.permute.xlu0 %1374  ;;  %v1413_v60 = vsel %vm1412_vm2, %v1408_v54, %v1371_v29  ;;  %v2029_v29 = vld [vmem:[%s3196_s4] ss:$0 sm:$0xff]  ;;  %s2316_s4 = sshll.u32 %s2425_s3, 4  ;;  %s2317_s4 = int_to_ptr.vmem [resolvable:$false] %s2316_s4 }
 0x29a   : > { %v1303_v41 = vpop.permute.xlu1 %1302  ;;  %v1415_v61 = vsel %vm1412_vm2, %v1410_v57, %v1375_v50  ;;  %v2048_v57 = vld [vmem:[%s3153_s10] ss:$0 sm:$0xff]  ;;  %p2319_p0 = scmp.lt.s32.totalorder %s3060_s1, %s2317_s4 }
 0x29b   : > { %v1391_v42 = vsel %vm1387_vm12, %v1386_v39, %v1303_v41 }
 0x29c   : > { %v1396_v43 = vsel %vm1392_vm13, %v1391_v42, %v1319_v17 }
 0x29d   : > { %v1401_v34 = vsel %vm1397_vm14, %v1396_v43, %v1335_v21 }
 0x29e   : > { %v1373_v47 = vpop.permute.xlu1 %1372  ;;  %v1406_v52 = vsel %vm1402_vm15, %v1401_v34, %v1351_v8  ;;  %v2255_v34 = vld [vmem:[%s3152_s9 + $0x8] sm:$0xff]  }
 0x29f   : > { %v1414_v53 = vsel %vm1412_vm2, %v1409_v55, %v1373_v47  ;;  %v1411_v58 = vsel %vm1407_vm1, %v1406_v52, %v1364_v30  ;;  %v2257_v47 = vld [vmem:[%s3154_s11 + $0x8] sm:$0xff]   ;;  %v2042_v52 = vld [vmem:[%s3151_s8] ss:$0 sm:$0xff] }
 0x2a0   : > { %v2025_v63 = vcombine.low %v1413_v60, %v1414_v53 }
 0x2a2   : > { %v1377_v59 = vpop.permute.xlu1 %1376 }
 0x2a3   : > { %v1416_v62 = vsel %vm1412_vm2, %v1411_v58, %v1377_v59 }
 0x2a4   : > { %v2027_v0 = vcombine.low %v1415_v61, %v1416_v62  ;;  %v2143_v1 = vpop.f32.mrb[0].mxu1 }
 0x2a5   : > { %v1128_v4 = vpop.f32.mrb[1].mxu1  ;;  %v1137_v6 = vadd.f32 %v2143_v1, %v2011_v2 }
 0x2a6   : > { %v1433_v3 = vpack.c.bf16 %v2027_v0, %v2025_v63  ;;  %v2144_v5 = vpop.f32.mrb[2].mxu1  ;;  %v1129_v10 = vadd.f32 %v2011_v2, %v1128_v4 }
 0x2a7   : > { %v1140_v7 = vadd.f32 %v2144_v5, %v2011_v2  ;;  %v1131_v9 = vpop.f32.mrb[3].mxu1 }
 0x2a8   : > { %1550 = vmatmul.mubr.bf16.vlgmr.msra.gmra.mrb[8].mxu1 %v1433_v3  ;;  %v1132_v11 = vadd.f32 %v2011_v2, %v1131_v9 }
 0x2a9   : > { %v2085_v16 = vpack.c.bf16 %v1140_v7, %v1137_v6 }
 0x2aa   : > { %v2080_v17 = vpack.c.bf16 %v1132_v11, %v1129_v10 }
 0x2ab   : > { %2102 = vst [vmem:[%s514_s27 + $0x8] sm:$0xff] %v2085_v16  }
 0x2ac   : > { %2081 = vst [vmem:[%s514_s27] sm:$0xff] %v2080_v17  }
 0x2e4   : > { %v2147_v18 = vpop.f32.mrb[4].mxu1 }
 0x2e5   : > { %v1144_v19 = vpop.f32.mrb[5].mxu1  ;;  %v1153_v21 = vadd.f32 %v2147_v18, %v2011_v2 }
 0x2e6   : > { %v2148_v20 = vpop.f32.mrb[6].mxu1  ;;  %v1145_v23 = vadd.f32 %v2011_v2, %v1144_v19 }
 0x2e7   : > { %v1156_v22 = vadd.f32 %v2148_v20, %v2011_v2  ;;  %v1147_v8 = vpop.f32.mrb[7].mxu1 }
 0x2e8   : > { %v1148_v24 = vadd.f32 %v2011_v2, %v1147_v8 }
 0x2e9   : > { %v2095_v25 = vpack.c.bf16 %v1156_v22, %v1153_v21 }
 0x2ea   : > { %v2090_v26 = vpack.c.bf16 %v1148_v24, %v1145_v23 }
 0x2eb   : > { %2104 = vst [vmem:[%s514_s27 + $0x18] sm:$0xff] %v2095_v25   ;;  %v1815_v25 = vlaneseq }
 0x2ec   : > { %2103 = vst [vmem:[%s514_s27 + $0x10] sm:$0xff] %v2090_v26   ;;  %s2312_s27 = scalar_lea.vmem %s3060_s1, 128 }
 0x2ed   : > { %v1816_v26 = vand.u32 127, %v1815_v25  ;;  %p2313_p11 = scmp.ne.s32.totalorder %s3060_s1, %s2312_s27 }
 0x2ef   : > { %vm1817_vm4 = vcmp.lt.s32.totalorder %v1816_v26, 5  ;;  %p2314_p12 = pnand %p2313_p11, %p2545_p5 }
 0x2f1   : > { %p2315_p13 = pneg %p2314_p12 }
 0x37b   : > { %v1551_v30 = vpop.f32.mrb[8].mxu1 }
 0x37c   : > { %v1552_v12 = vadd.f32 %v2029_v29, %v1551_v30  ;;  %v1553_v31 = vpop.f32.mrb[9].mxu1 }
 0x37d   : > { %v1554_v32 = vpop.f32.mrb[10].mxu1 }
 0x37e   : > { %v2040_v33 = vmul.f32 -1.442695, %v1552_v12  ;;  %v1555_v35 = vadd.f32 %v2029_v29, %v1554_v32  ;;  %v1556_v15 = vpop.f32.mrb[11].mxu1 }
 0x380   : > { %2292 = vpow2.f32 %v2040_v33  ;;  %v2041_v36 = vmul.f32 -1.442695, %v1555_v35 }
 0x382   : > { %2294 = vpow2.f32 %v2041_v36 }
 0x38a   : > { %v2293_v37 = vpop.eup %2292 }
 0x38b   : > { %v1564_v14 = vadd.f32 1.0, %v2293_v37 }
 0x38c   : > { %v2295_v38 = vpop.eup %2294 }
 0x38d   : > { %2296 = vrcp.f32 %v1564_v14  ;;  %v1565_v39 = vadd.f32 1.0, %v2295_v38 }
 0x38f   : > { %2298 = vrcp.f32 %v1565_v39 }
 0x397   : > { %v2297_v40 = vpop.eup %2296 }
 0x398   : > { %v1570_v42 = vmul.f32 %v2297_v40, %v1552_v12 }
 0x399   : > { %v2299_v41 = vpop.eup %2298 }
 0x39a   : > { %v1571_v45 = vmul.f32 %v2299_v41, %v1555_v35 }
 0x39c   : > { %v1572_v43 = vpack.c.bf16 %v1571_v45, %v1570_v42 }
 0x39e   : > { %2154 = vmatmul.mubr.msk.bf16.vlgmr.msra.gmra.mrb[8].mxu0 %vm1387_vm12, %v1572_v43 }
 0x39f   : > { %2158 = vmatpush3.bf16.msra.mxu0 %v2254_v46  ;;  %2161 = vmatprep.mubr.msk.bf16.mxu0 %vm2424_vm3, %v2416_v13 }
 0x3a0   : > { %2159 = vmatprep.subr.bf16.mxu0 %v2416_v13 }
 0x3a3   : > { %2160 = vmatpush3.bf16.msra.mxu0 %v2255_v34 }
 0x3a4   : > { %2165 = vmatprep.subr.bf16.mxu0 %v2416_v13 }
 0x3a6   : > { %2162 = vmatmul.mubr.msk.bf16.vlgmr.msra.gmra.mrb[12].mxu0 %vm1387_vm12, %v1572_v43 }
 0x3a7   : > { %2173 = vmatprep.mubr.msk.bf16.mxu0 %vm2424_vm3, %v2416_v13  ;;  %2166 = vmatpush3.bf16.msra.mxu0 %v2256_v44 }
 0x3a8   : > { %2167 = vmatprep.subr.bf16.mxu0 %v2416_v13 }
 0x3ab   : > { %2168 = vmatpush3.bf16.msra.mxu0 %v2257_v47 }
 0x3ac   : > { %2169 = vmatprep.subr.bf16.mxu0 %v2416_v13 }
 0x3af   : > { %2170 = vmatpush3.bf16.msra.mxu0 %v2258_v48 }
 0x3b0   : > { %2171 = vmatprep.subr.bf16.mxu0 %v2416_v13 }
 0x3b3   : > { %2172 = vmatpush3.bf16.msra.mxu0 %v2259_v51 }
 0x471   : > { %v1633_v49 = vpop.f32.mrb[8].mxu0 }
 0x472   : > { %v2155_v50 = vpop.f32.mrb[9].mxu0  ;;  %v1634_v56 = vadd.f32 %v2042_v52, %v1633_v49 }
 0x473   : > { %v1636_v55 = vpop.f32.mrb[10].mxu0 }
 0x474   : > { %v1637_v53 = vadd.f32 %v2042_v52, %v1636_v55  ;;  %v2156_v54 = vpop.f32.mrb[11].mxu0 }
 0x476   : > { %v2100_v13 = vpack.c.bf16 %v1637_v53, %v1634_v56 }
 0x478   : > { %2101 = vst [vmem:[%s3048_s0] sm:$0xff] %v2100_v13   ;;  %s2318_s0 = scalar_lea.vmem %s2317_s4, 256 }
 0x479   : > { %v1707_v58 = vpop.f32.mrb[12].mxu0  ;;  %p2320_p1 = scmp.lt.s32.totalorder %s2318_s0, %s2312_s27 }
 0x47a   : > { %v1708_v59 = vadd.f32 %v2048_v57, %v1707_v58  ;;  %v2163_v60 = vpop.f32.mrb[13].mxu0 }
 0x47b   : > { %v1710_v61 = vpop.f32.mrb[14].mxu0  ;;  %p2321_p2 = por %p2320_p1, %p2319_p0 }
 0x47c   : > { %v2052_v62 = vmul.f32 -1.442695, %v1708_v59  ;;  %v1711_v63 = vadd.f32 %v2048_v57, %v1710_v61  ;;  %v2164_v0 = vpop.f32.mrb[15].mxu0 }
 0x47d   : > { %p2322_p3 = pnand %p2321_p2, %p2315_p13 }
 0x47e   : > { %2300 = vpow2.f32 %v2052_v62  ;;  %v2053_v1 = vmul.f32 -1.442695, %v1711_v63 }
 0x480   : > { %2302 = vpow2.f32 %v2053_v1 }
 0x488   : > { %v2301_v2 = vpop.eup %2300 }
 0x489   : > { %v1720_v3 = vadd.f32 1.0, %v2301_v2 }
 0x48a   : > { %v2303_v4 = vpop.eup %2302 }
 0x48b   : > { %2304 = vrcp.f32 %v1720_v3  ;;  %v1721_v5 = vadd.f32 1.0, %v2303_v4 }
 0x48d   : > { %2306 = vrcp.f32 %v1721_v5 }
 0x495   : > { %v2305_v6 = vpop.eup %2304 }
 0x496   : > { %v1726_v7 = vmul.f32 %v2305_v6, %v1708_v59 }
 0x497   : > { %v2307_v9 = vpop.eup %2306 }
 0x498   : > { %v1727_v10 = vmul.f32 %v2307_v9, %v1711_v63  ;;  %v1728_v11 = vsel %vm1397_vm14, %v1726_v7, 0.0 }
 0x49a   : > { %v1729_v16 = vsel %vm1397_vm14, %v1727_v10, 0.0 }
 0x49b   : > { %v1730_v17 = vadd.f32 %v1729_v16, %v1728_v11 }
 0x49d   : > { %v1731_v18 = vrot.slane %v1730_v17, 4 }
 0x49f   : > { %v1732_v19 = vadd.f32 %v1731_v18, %v1730_v17 }
 0x4a1   : > { %v1733_v20 = vrot.slane %v1732_v19, 2 }
 0x4a3   : > { %v1734_v21 = vadd.f32 %v1733_v20, %v1732_v19 }
 0x4a5   : > { %v1735_v22 = vrot.slane %v1734_v21, 1 }
 0x4a7   : > { %v1736_v8 = vadd.f32 %v1735_v22, %v1734_v21 }
 0x4a9   : > { %v1737_v23 = vmul.f32 0.0625, %v1736_v8 }
 0x4ab   : > { %v1738_v24 = vpack.c.bf16 %v1737_v23, %v1737_v23 }
 0x4ad   : > { %2174 = vmatmul.mubr.msk.bf16.vlgmr.msra.gmra.mrb[16].mxu0 %vm1397_vm14, %v1738_v24 }
 0x580   : > { %v1809_v28 = vpop.f32.mrb[16].mxu0 }
 0x581   : > { %v1810_v29 = vadd.f32 %v1809_v28, %v1747_v27  ;;  %v2175_v30 = vpop.f32.mrb[17].mxu0 }
 0x582   : > { %v1812_v12 = vpop.f32.mrb[18].mxu0 }
 0x583   : > { %v2176_v31 = vpop.f32.mrb[19].mxu0  ;;  %v1818_v32 = vsel %vm1817_vm4, %v1810_v29, -1e+30 }
 0x584   : > { %v1819_v33 = vsel %vm938_vm0, %v1818_v32, -inf }
 0x585   : > { %1820 = vmax.xlane.f32.xlu0 %v1819_v33 }
 0x612   : > { %v1821_v35 = vpop.xlane.xlu0 %1820 }
 0x613   : > { %v1822_v15 = vsub.f32 %v1818_v32, %v1821_v35 }
 0x615   : > { %v1823_v36 = vmul.f32 1.442695, %v1822_v15 }
 0x617   : > { %2308 = vpow2.f32 %v1823_v36 }
 0x621   : > { %v2309_v37 = vpop.eup %2308 }
 0x622   : > { %v1825_v14 = vsel %vm938_vm0, %v2309_v37, 0.0 }
 0x623   : > { %1826 = vadd.xlane.f32.xlu1 %v1825_v14 }
 0x624   : > { %2325 = shalt.err (!%p2322_p3)
}
 0x625   : > { %s2326_s16 = scalar_lea.hbm %s3066_s26, 128  ;;  %s2330_s3 = scalar_lea.hbm %s3157_s14, 256 }
 0x626   : > { %p2327_p4 = scmp.ne.s32.totalorder %s3066_s26, %s2326_s16  ;;  %p2331_p9 = scmp.lt.u32.totalorder %s3066_s26, %s3157_s14 }
 0x627   : > { %p2332_p10 = scmp.lt.u32.totalorder %s2330_s3, %s2326_s16  ;;  %p2334_p12 = scmp.lt.u32.totalorder %s2326_s16, %s3066_s26 }
 0x628   : > { %p2328_p7 = pnand %p2327_p4, %p2545_p5 }
 0x629   : > { %p2333_p11 = por %p2332_p10, %p2331_p9 }
 0x62a   : > { %p2329_p8 = pneg %p2328_p7 }
 0x62b   : > { %p2335_p13 = por %p2334_p12, %p2333_p11 }
 0x62d   : > { %p2336_p0 = pnand %p2335_p13, %p2329_p8 }
 0x62f   : > { %2339 = shalt.err (!%p2336_p0)
}
 0x630   : > { %s3197_s27 = smov 64   ;;  %s3198_s0 = scalar_lea.sflag [#allocation4], %s3039_s30 }
 0x631   : > { %2179 = dma.vmem_to_hbm [thread:$0]  (%p2545_p5), %s3060_s1, 128, %s3066_s26, %s3198_s0, %s3197_s27, %s3197_s27, %s3188_s17  }
 0x632   : > { %s2062_s23 = sshll.u32 %s2528_s22, 4  ;;  %s504_s16 = scalar_lea.vmem [#allocation5], %s3039_s30 }
 0x633   : > { %s1876_s2 = sshll.u32 %s504_s16, 4  ;;  %s3100_s4 = scalar_lea.hbm %s3158_s15, %s2062_s23  ;;  %s3102_s2 = int_to_ptr.vmem [resolvable:$true] %s1876_s2 }
 0x634   : > { %s1845_s17 = scalar_lea.sflag [#allocation6], %s3039_s30  ;;  %s2340_s1 = scalar_lea.vmem %s3102_s2, 16 }
 0x635   : > { %p2341_p1 = scmp.ne.s32.totalorder %s3102_s2, %s2340_s1  ;;  %s2426_s22 = smov [#allocation5]  }
 0x636   : > { %s2344_s26 = sshll.u32 %s2426_s22, 4  ;;  %s2345_s26 = int_to_ptr.vmem [resolvable:$false] %s2344_s26 }
 0x637   : > { %p2342_p2 = pnand %p2341_p1, %p2545_p5  ;;  %s2346_s27 = scalar_lea.vmem %s2345_s26, 32 }
 0x638   : > { %p2347_p4 = scmp.lt.s32.totalorder %s3102_s2, %s2345_s26  ;;  %p2348_p7 = scmp.lt.s32.totalorder %s2346_s27, %s2340_s1 }
 0x639   : > { %p2343_p3 = pneg %p2342_p2 }
 0x63a   : > { %p2349_p8 = por %p2348_p7, %p2347_p4 }
 0x63c   : > { %p2350_p9 = pnand %p2349_p8, %p2343_p3 }
 0x6b0   : > { %v1827_v38 = vpop.xlane.xlu1 %1826 }
 0x6b1   : > { %2310 = vrcp.f32 %v1827_v38 }
 0x6bb   : > { %v2311_v39 = vpop.eup %2310 }
 0x6bc   : > { %v1829_v40 = vmul.f32 %v2311_v39, %v1827_v38 }
 0x6be   : > { %v1830_v41 = vsub.f32 2.0, %v1829_v40 }
 0x6c0   : > { %v1831_v42 = vmul.f32 %v2311_v39, %v1830_v41 }
 0x6c2   : > { %v1832_v45 = vmul.f32 %v2309_v37, %v1831_v42 }
 0x6c4   : > { %1833 = vst [vmem:[%s504_s16] sm:$0x1] %v1832_v45 }
 0x6c5   : > { %2353 = shalt.err (!%p2350_p9)
}
 0x6c6   : > { %s2354_s30 = scalar_lea.hbm %s3100_s4, 16  ;;  %s2358_s16 = scalar_lea.hbm %s3158_s15, 32 }
 0x6c7   : > { %p2355_p10 = scmp.ne.s32.totalorder %s3100_s4, %s2354_s30  ;;  %p2359_p13 = scmp.lt.u32.totalorder %s3100_s4, %s3158_s15 }
 0x6c8   : > { %p2360_p0 = scmp.lt.u32.totalorder %s2358_s16, %s2354_s30  ;;  %p2362_p2 = scmp.lt.u32.totalorder %s2354_s30, %s3100_s4 }
 0x6c9   : > { %p2356_p11 = pnand %p2355_p10, %p2545_p5 }
 0x6ca   : > { %p2361_p1 = por %p2360_p0, %p2359_p13 }
 0x6cb   : > { %p2357_p12 = pneg %p2356_p11 }
 0x6cc   : > { %p2363_p3 = por %p2362_p2, %p2361_p1 }
 0x6ce   : > { %p2364_p4 = pnand %p2363_p3, %p2357_p12 }
 0x6d0   : > { %2367 = shalt.err (!%p2364_p4)
}
 0x6d1   : > { %2180 = dma.vmem_to_hbm [thread:$0]  (%p2545_p5), %s3102_s2, 16, %s3100_s4, %s1845_s17  }
 0x6d2 PF: > { %p2190_p7 = scmp.ge.s32.totalorder %s2406_s21, 2  ;;  %s1896_s1 = sand.u32 1, %s2394_s18  }
 0x6d3   : > { %s1897_s22 = scalar_lea.sflag [#allocation4], %s1896_s1 }
 0x6d4   : > { %p2184_p8 = pnand %p2190_p7, %p2549_p6 }
 0x6d6   : > { %2385 = dma.done.wait (!%p2184_p8), %s1897_s22, 128  }
 0x6d7   : > { %2387 = vsyncadd (!%p2184_p8), %s1897_s22, 4294967168  ;;  %s1906_s26 = scalar_lea.sflag [#allocation6], %s1896_s1 }
 0x6d8   : > { %2389 = dma.done.wait (!%p2184_p8), %s1906_s26, 16  }
 0x6d9   : > { %2391 = vsyncadd (!%p2184_p8), %s1906_s26, 4294967280  ;;  %s3199_s28 = sld [smem:[#allocation9_spill]]  ;;  %p29_p5 = scmp.ge.s32.totalorder %s2532_s24, 4  }
 0x6da   : > { %s3200_s18 = smov %s2398_s19  ;;  %s3201_s19 = smov %s2402_s20 }
 0x6db   : > { %s3203_s21 = smov %s2532_s24  ;;  %31 = sbr.rel (!%p29_p5) target bundleno = 11 (0xb), region = 152 }
 0x6df   : > { %s3202_s20 = smov %s3199_s28 }
 0x6e2   :  { %1910 = vsyncpa [#allocation4], 1 }
 0x6e3   :  { %1912 = vsyncpa [#allocation4 + $0x1], 1 }
 0x6e4   :  { %1913 = vsyncpa [#allocation6], 1 }
 0x6e5   :  { %1915 = vsyncpa [#allocation6 + $0x1], 1 }

</bundles_post_ra>
